<compile_context>
chip_gen: v6e
topology: v6e:2x2x1
jax: 0.10.0
libtpu: 0.0.40
codegen_flags: <defaults>
</compile_context>

<pallas_src>
import functools

import jax
import jax.numpy as jnp
import numpy as np
from jax import lax
from jax.experimental import pallas as pl
from jax.experimental.pallas import tpu as pltpu

NUM_CLASSES = 20
NUM_BINS = 16
LAMBDA_BOX = 7.5
LAMBDA_OBJ = 1.0
LAMBDA_CLS = 0.5
_LANE = 128


def _round_up(x, m):
    return ((x + m - 1) // m) * m


def yolov8_loss_kernel(preds_ref, tgt_ref, out_ref, *, n_total, tile_n):
    """One grid step = one channel-major (C, tile_n) slab of grid cells.

    preds_ref: (C, TN)  rows = [64 box-bin logits | conf | 20 class logits]
    tgt_ref  : (6, TN)  rows = [cls, x1, y1, x2, y2, conf]
    out_ref  : (1, 1, 128) lane-packed partials:
               lane0=box_sum  lane1=obj_sum  lane2=cls_sum  lane3=n_pos
    """
    NB, NC = NUM_BINS, NUM_CLASSES
    f32 = jnp.float32

    # ---- validity of the columns in this tile (ragged last tile, no host padding) ----
    col = (lax.broadcasted_iota(jnp.int32, (1, tile_n), 1)
           + pl.program_id(0) * tile_n)
    valid = col < n_total                                            # (1, TN) bool

    tgt = tgt_ref[...].astype(f32)                                   # (6, TN)
    cls_t = tgt[0:1, :]                                              # (1, TN)
    box_t = tgt[1:5, :]                                              # (4, TN)
    conf_t = tgt[5:6, :]                                             # (1, TN)
    pos = jnp.logical_and(conf_t > 0.0, valid)                       # (1, TN) bool

    # -------- Distribution Focal Loss, fused over the 4 coordinates --------
    # rows 0..63 are sublane-aligned -> the (4, NB, TN) view is a free relabeling.
    x_box = preds_ref[0:4 * NB, :].astype(f32).reshape(4, NB, tile_n)
    m = jnp.max(x_box, axis=1, keepdims=True)                        # (4, 1, TN)
    e = jnp.exp(x_box - m)                                           # (4, NB, TN)  EUP
    s = jnp.sum(e, axis=1)                                           # (4, TN)
    inv_s = 1.0 / s                                                  # shared exact recip

    t = box_t * float(NB)                                            # (4, TN) target in bins
    tl = jnp.floor(t)
    wr = t - tl
    wl = 1.0 - wr
    li = jnp.clip(tl, 0.0, float(NB - 1)).astype(jnp.int32)[:, None, :]        # (4,1,TN)
    ri = jnp.clip(tl + 1.0, 0.0, float(NB - 1)).astype(jnp.int32)[:, None, :]  # (4,1,TN)

    bins = lax.broadcasted_iota(jnp.int32, (4, NB, tile_n), 1)
    e_l = jnp.sum(jnp.where(bins == li, e, 0.0), axis=1)             # (4, TN)
    e_r = jnp.sum(jnp.where(bins == ri, e, 0.0), axis=1)             # (4, TN)
    # exact reference semantics: -log(p + 1e-6), p = e / s
    dfl = -(jnp.log(e_l * inv_s + 1e-6) * wl
            + jnp.log(e_r * inv_s + 1e-6) * wr)                      # (4, TN)
    box_per_cell = jnp.sum(dfl, axis=0, keepdims=True)               # (1, TN)
    box_sum = jnp.sum(jnp.where(pos, box_per_cell, 0.0),
                      axis=1, keepdims=True)                         # (1, 1)

    # -------- objectness BCE + class BCE --------
    # rows 64..84 = [conf, cls0..cls19]; row 64 is sublane-aligned, so this slab is a
    # cheap view and no misaligned 20-row slice is ever taken.
    tail = preds_ref[4 * NB:4 * NB + 1 + NC, :].astype(f32)          # (1+NC, TN)
    # "positive part" of BCE-with-logits: softplus+(x) = max(x,0) + log1p(exp(-|x|))
    sp = jnp.maximum(tail, 0.0) + jnp.log1p(jnp.exp(-jnp.abs(tail)))
    conf_logit = tail[0:1, :]
    sp_conf = sp[0:1, :]

    # objectness: BCE(x, y) = softplus+(x) - x*y, averaged over ALL cells (mask=valid)
    obj_per_cell = sp_conf - conf_logit * conf_t                     # (1, TN)
    obj_sum = jnp.sum(jnp.where(valid, obj_per_cell, 0.0),
                      axis=1, keepdims=True)                         # (1, 1)

    # class BCE (positives only): sum_c BCE(x_c, onehot_c) = sum_c softplus+(x_c) - x_tgt
    sp_cls_sum = jnp.sum(sp, axis=0, keepdims=True) - sp_conf        # (1, TN)
    rows = lax.broadcasted_iota(jnp.int32, (1 + NC, tile_n), 0)
    cls_i = cls_t.astype(jnp.int32) + 1                              # class c lives at row c+1
    x_target = jnp.sum(jnp.where(rows == cls_i, tail, 0.0),
                       axis=0, keepdims=True)                        # (1, TN)
    cls_per_cell = sp_cls_sum - x_target
    cls_sum = jnp.sum(jnp.where(pos, cls_per_cell, 0.0),
                      axis=1, keepdims=True)                         # (1, 1)

    n_pos = jnp.sum(jnp.where(pos, 1.0, 0.0), axis=1, keepdims=True)  # (1, 1)

    # ---- one lane-packed, lane-dense 128-wide row of partials per tile ----
    lane = lax.broadcasted_iota(jnp.int32, (1, _LANE), 1)
    row = (jnp.where(lane == 0, box_sum, 0.0)
           + jnp.where(lane == 1, obj_sum, 0.0)
           + jnp.where(lane == 2, cls_sum, 0.0)
           + jnp.where(lane == 3, n_pos, 0.0))
    out_ref[0] = row


@functools.partial(jax.jit, static_argnames=("tile_n",))
def yolov8_loss(predictions, targets, *, tile_n=2048):
    """Returns (total_loss, box_loss, cls_loss) matching YOLOv8Loss.forward."""
    B, S = targets.shape[0], targets.shape[1]
    C = 4 * NUM_BINS + 1 + NUM_CLASSES
    N = B * S * S

    # Free reshapes; the transpose below is the one remaining wrapper-side HBM copy.
    # TODO(synk): emit channel-major (C, N) from the detection head to remove it.
    preds_t = jnp.transpose(predictions.reshape(N, C))               # (C, N), dtype preserved
    tgts_t = jnp.transpose(targets.reshape(N, 6))                    # (6, N)

    # Tile selection: lane-aligned, as wide as requested, but always >= 2 tiles when
    # N > 128 so the "parallel" grid axis can split across v7x's two TensorCores.
    tile_eff = max(_LANE, min(tile_n, _round_up(N, _LANE)))
    if N > _LANE:
        tile_eff = min(tile_eff, _round_up(pl.cdiv(N, 2), _LANE))
    num_tiles = pl.cdiv(N, tile_eff)

    kernel = functools.partial(yolov8_loss_kernel, n_total=N, tile_n=tile_eff)

    cost = pl.CostEstimate(
        flops=600 * N,
        transcendentals=110 * N,
        bytes_accessed=int(preds_t.size * preds_t.dtype.itemsize
                           + tgts_t.size * tgts_t.dtype.itemsize
                           + num_tiles * _LANE * 4),
    )

    partials = pl.pallas_call(
        kernel,
        out_shape=jax.ShapeDtypeStruct((num_tiles, 1, _LANE), jnp.float32),
        grid=(num_tiles,),
        in_specs=[
            pl.BlockSpec((C, tile_eff), lambda i: (0, i)),
            pl.BlockSpec((6, tile_eff), lambda i: (0, i)),
        ],
        out_specs=pl.BlockSpec((1, 1, _LANE), lambda i: (i, 0, 0)),
        compiler_params=pltpu.CompilerParams(
            dimension_semantics=("parallel",),
            vmem_limit_bytes=32 * 1024 * 1024,
        ),
        cost_estimate=cost,
    )(preds_t, tgts_t)

    sums = jnp.sum(partials[:, 0, :], axis=0)                        # (128,)
    box_sum, obj_sum, cls_sum, n_pos = sums[0], sums[1], sums[2], sums[3]

    safe_npos = jnp.maximum(n_pos, 1.0)
    box_loss = jnp.where(n_pos > 0, box_sum / (4.0 * safe_npos), 0.0)
    obj_loss = obj_sum / float(N)
    cls_loss = jnp.where(n_pos > 0, cls_sum / (safe_npos * NUM_CLASSES), 0.0)
    total = LAMBDA_BOX * box_loss + LAMBDA_OBJ * obj_loss + LAMBDA_CLS * cls_loss
    return total, box_loss, cls_loss


def reference_loss(predictions, targets):
    """Pure-JAX reference mirroring the PyTorch forward, for verification."""
    B, S = targets.shape[0], targets.shape[1]
    C = 4 * NUM_BINS + 1 + NUM_CLASSES
    preds = predictions.reshape(B, S, S, C).astype(jnp.float32)
    bbox = preds[..., :4 * NUM_BINS].reshape(B, S, S, 4, NUM_BINS)
    conf_logits = preds[..., 4 * NUM_BINS]
    cls_logits = preds[..., 4 * NUM_BINS + 1:]
    target_box = targets[..., 1:5] * NUM_BINS
    target_conf = targets[..., 5]
    target_cls = targets[..., 0].astype(jnp.int32)
    maskf = (target_conf > 0).astype(jnp.float32)
    npos = maskf.sum()

    probs = jax.nn.softmax(bbox, axis=-1)
    tl = jnp.floor(target_box)
    wr = target_box - tl
    wl = 1.0 - wr
    li = jnp.clip(tl, 0, NUM_BINS - 1).astype(jnp.int32)
    ri = jnp.clip(tl + 1, 0, NUM_BINS - 1).astype(jnp.int32)
    lp = jnp.take_along_axis(probs, li[..., None], axis=-1)[..., 0]
    rp = jnp.take_along_axis(probs, ri[..., None], axis=-1)[..., 0]
    dfl = -jnp.log(lp + 1e-6) * wl - jnp.log(rp + 1e-6) * wr
    box_loss = jnp.where(
        npos > 0,
        jnp.sum(dfl * maskf[..., None]) / (4.0 * jnp.maximum(npos, 1.0)),
        0.0)

    def bce(x, y):
        return jnp.maximum(x, 0.0) - x * y + jnp.log1p(jnp.exp(-jnp.abs(x)))

    obj_loss = bce(conf_logits, target_conf).mean()
    oh = jax.nn.one_hot(target_cls, NUM_CLASSES)
    cls_loss = jnp.where(
        npos > 0,
        jnp.sum(bce(cls_logits, oh) * maskf[..., None]) / (jnp.maximum(npos, 1.0) * NUM_CLASSES),
        0.0)
    total = LAMBDA_BOX * box_loss + LAMBDA_OBJ * obj_loss + LAMBDA_CLS * cls_loss
    return total, box_loss, cls_loss


if __name__ == "__main__":
    # NOTE: the module has no learnable state affecting the forward (bin_vals unused).
    B, S = 2, 12                        # N = B*S*S = 288 -> 2 tiles (256 + ragged 32)
    C = 4 * NUM_BINS + 1 + NUM_CLASSES  # 85

    key = jax.random.PRNGKey(0)
    k1, k2, k3, k4 = jax.random.split(key, 4)
    predictions = jax.random.normal(k1, (B, S, S, C), dtype=jnp.float32)
    cls_id = jax.random.randint(k2, (B, S, S, 1), 0, NUM_CLASSES).astype(jnp.float32)
    box = jax.random.uniform(k3, (B, S, S, 4), dtype=jnp.float32)
    conf = (jax.random.uniform(k4, (B, S, S, 1)) > 0.5).astype(jnp.float32)
    targets = jnp.concatenate([cls_id, box, conf], axis=-1)          # (B, S, S, 6)

    total, box_loss, cls_loss = yolov8_loss(predictions, targets)
    jax.block_until_ready(total)

    ref_total, ref_box, ref_cls = reference_loss(predictions, targets)
    np.testing.assert_allclose(np.asarray(total), np.asarray(ref_total), rtol=1e-4, atol=1e-4)
    np.testing.assert_allclose(np.asarray(box_loss), np.asarray(ref_box), rtol=1e-4, atol=1e-4)
    np.testing.assert_allclose(np.asarray(cls_loss), np.asarray(ref_cls), rtol=1e-4, atol=1e-4)

    print("KERNEL_OK")
</pallas_src>

<mosaic_0001>
module attributes {stable_mosaic.version = 11 : i64} {
  func.func @yolov8_loss_kernel(%arg0: i32, %arg1: memref<85x256xf32, #tpu.memory_space<vmem>>, %arg2: memref<6x256xf32, #tpu.memory_space<vmem>>, %arg3: memref<1x1x128xf32, #tpu.memory_space<vmem>>) attributes {dimension_semantics = [#tpu.dimension_semantics<parallel>], iteration_bounds = array<i64: 2>, scalar_prefetch = 0 : i64, scratch_operands = 0 : i64, tpu.core_type = #tpu.core_type<tc>, window_params = [{transform_indices = @transform_0, window_bounds = array<i64: 85, 256>}, {transform_indices = @transform_1, window_bounds = array<i64: 6, 256>}, {transform_indices = @transform_2, window_bounds = array<i64: 1, 1, 128>}]} {
    %0 = tpu.iota {dimensions = array<i32: 1>} : vector<1x256xi32>
    %c256_i32 = arith.constant 256 : i32
    %1 = arith.muli %arg0, %c256_i32 : i32
    %2 = vector.broadcast %1 : i32 to vector<1x256xi32>
    %3 = arith.addi %0, %2 : vector<1x256xi32>
    %c288_i32 = arith.constant 288 : i32
    %4 = vector.broadcast %c288_i32 : i32 to vector<1x256xi32>
    %5 = arith.cmpi slt, %3, %4 : vector<1x256xi32>
    %c0 = arith.constant 0 : index
    %c0_0 = arith.constant 0 : index
    %6 = vector.load %arg2[%c0, %c0_0] : memref<6x256xf32, #tpu.memory_space<vmem>>, vector<6x256xf32>
    %7 = vector.extract_strided_slice %6 {offsets = [0, 0], sizes = [1, 256], strides = [1, 1]} : vector<6x256xf32> to vector<1x256xf32>
    %8 = vector.extract_strided_slice %6 {offsets = [1, 0], sizes = [4, 256], strides = [1, 1]} : vector<6x256xf32> to vector<4x256xf32>
    %9 = vector.extract_strided_slice %6 {offsets = [5, 0], sizes = [1, 256], strides = [1, 1]} : vector<6x256xf32> to vector<1x256xf32>
    %cst = arith.constant 0.000000e+00 : f32
    %10 = vector.broadcast %cst : f32 to vector<1x256xf32>
    %11 = arith.cmpf ogt, %9, %10 : vector<1x256xf32>
    %12 = arith.andi %11, %5 : vector<1x256xi1>
    %c0_1 = arith.constant 0 : index
    %c0_2 = arith.constant 0 : index
    %13 = vector.load %arg1[%c0_1, %c0_2] : memref<85x256xf32, #tpu.memory_space<vmem>>, vector<64x256xf32>
    %14 = vector.shape_cast %13 : vector<64x256xf32> to vector<4x16x256xf32>
    %cst_3 = arith.constant dense<0xFF800000> : vector<4x256xf32>
    %15 = vector.multi_reduction <maximumf>, %14, %cst_3 [1] : vector<4x16x256xf32> to vector<4x256xf32>
    %16 = vector.shape_cast %15 : vector<4x256xf32> to vector<4x1x256xf32>
    %17 = vector.broadcast %16 : vector<4x1x256xf32> to vector<4x16x256xf32>
    %18 = arith.subf %14, %17 : vector<4x16x256xf32>
    %19 = math.exp %18 : vector<4x16x256xf32>
    %cst_4 = arith.constant dense<0.000000e+00> : vector<4x256xf32>
    %20 = vector.multi_reduction <add>, %19, %cst_4 [1] : vector<4x16x256xf32> to vector<4x256xf32>
    %cst_5 = arith.constant 1.000000e+00 : f32
    %21 = vector.broadcast %cst_5 : f32 to vector<4x256xf32>
    %22 = arith.divf %21, %20 : vector<4x256xf32>
    %cst_6 = arith.constant 1.600000e+01 : f32
    %23 = vector.broadcast %cst_6 : f32 to vector<4x256xf32>
    %24 = arith.mulf %8, %23 : vector<4x256xf32>
    %25 = math.floor %24 : vector<4x256xf32>
    %26 = arith.subf %24, %25 : vector<4x256xf32>
    %cst_7 = arith.constant 1.000000e+00 : f32
    %27 = vector.broadcast %cst_7 : f32 to vector<4x256xf32>
    %28 = arith.subf %27, %26 : vector<4x256xf32>
    %cst_8 = arith.constant 0.000000e+00 : f32
    %cst_9 = arith.constant 1.500000e+01 : f32
    %29 = vector.broadcast %cst_8 : f32 to vector<4x256xf32>
    %30 = arith.maximumf %29, %25 : vector<4x256xf32>
    %31 = vector.broadcast %cst_9 : f32 to vector<4x256xf32>
    %32 = arith.minimumf %31, %30 : vector<4x256xf32>
    %33 = arith.fptosi %32 : vector<4x256xf32> to vector<4x256xi32>
    %34 = vector.shape_cast %33 : vector<4x256xi32> to vector<4x1x256xi32>
    %cst_10 = arith.constant 1.000000e+00 : f32
    %35 = vector.broadcast %cst_10 : f32 to vector<4x256xf32>
    %36 = arith.addf %25, %35 : vector<4x256xf32>
    %cst_11 = arith.constant 0.000000e+00 : f32
    %cst_12 = arith.constant 1.500000e+01 : f32
    %37 = vector.broadcast %cst_11 : f32 to vector<4x256xf32>
    %38 = arith.maximumf %37, %36 : vector<4x256xf32>
    %39 = vector.broadcast %cst_12 : f32 to vector<4x256xf32>
    %40 = arith.minimumf %39, %38 : vector<4x256xf32>
    %41 = arith.fptosi %40 : vector<4x256xf32> to vector<4x256xi32>
    %42 = vector.shape_cast %41 : vector<4x256xi32> to vector<4x1x256xi32>
    %43 = tpu.iota {dimensions = array<i32: 1>} : vector<4x16x256xi32>
    %44 = vector.broadcast %34 : vector<4x1x256xi32> to vector<4x16x256xi32>
    %45 = arith.cmpi eq, %43, %44 : vector<4x16x256xi32>
    %cst_13 = arith.constant 0.000000e+00 : f32
    %46 = vector.broadcast %cst_13 : f32 to vector<4x16x256xf32>
    %47 = arith.select %45, %19, %46 : vector<4x16x256xi1>, vector<4x16x256xf32>
    %cst_14 = arith.constant dense<0.000000e+00> : vector<4x256xf32>
    %48 = vector.multi_reduction <add>, %47, %cst_14 [1] : vector<4x16x256xf32> to vector<4x256xf32>
    %49 = vector.broadcast %42 : vector<4x1x256xi32> to vector<4x16x256xi32>
    %50 = arith.cmpi eq, %43, %49 : vector<4x16x256xi32>
    %cst_15 = arith.constant 0.000000e+00 : f32
    %51 = vector.broadcast %cst_15 : f32 to vector<4x16x256xf32>
    %52 = arith.select %50, %19, %51 : vector<4x16x256xi1>, vector<4x16x256xf32>
    %cst_16 = arith.constant dense<0.000000e+00> : vector<4x256xf32>
    %53 = vector.multi_reduction <add>, %52, %cst_16 [1] : vector<4x16x256xf32> to vector<4x256xf32>
    %54 = arith.mulf %48, %22 : vector<4x256xf32>
    %cst_17 = arith.constant 9.99999997E-7 : f32
    %55 = vector.broadcast %cst_17 : f32 to vector<4x256xf32>
    %56 = arith.addf %54, %55 : vector<4x256xf32>
    %57 = math.log %56 : vector<4x256xf32>
    %58 = arith.mulf %57, %28 : vector<4x256xf32>
    %59 = arith.mulf %53, %22 : vector<4x256xf32>
    %cst_18 = arith.constant 9.99999997E-7 : f32
    %60 = vector.broadcast %cst_18 : f32 to vector<4x256xf32>
    %61 = arith.addf %59, %60 : vector<4x256xf32>
    %62 = math.log %61 : vector<4x256xf32>
    %63 = arith.mulf %62, %26 : vector<4x256xf32>
    %64 = arith.addf %58, %63 : vector<4x256xf32>
    %cst_19 = arith.constant 0.000000e+00 : f32
    %65 = vector.broadcast %cst_19 : f32 to vector<4x256xf32>
    %66 = arith.subf %65, %64 : vector<4x256xf32>
    %cst_20 = arith.constant dense<0.000000e+00> : vector<256xf32>
    %67 = vector.multi_reduction <add>, %66, %cst_20 [0] : vector<4x256xf32> to vector<256xf32>
    %68 = vector.shape_cast %67 : vector<256xf32> to vector<1x256xf32>
    %cst_21 = arith.constant 0.000000e+00 : f32
    %69 = vector.broadcast %cst_21 : f32 to vector<1x256xf32>
    %70 = arith.select %12, %68, %69 : vector<1x256xi1>, vector<1x256xf32>
    %cst_22 = arith.constant dense<0.000000e+00> : vector<1xf32>
    %71 = vector.multi_reduction <add>, %70, %cst_22 [1] : vector<1x256xf32> to vector<1xf32>
    %72 = vector.shape_cast %71 : vector<1xf32> to vector<1x1xf32>
    %c64 = arith.constant 64 : index
    %c0_23 = arith.constant 0 : index
    %73 = vector.load %arg1[%c64, %c0_23] : memref<85x256xf32, #tpu.memory_space<vmem>>, vector<21x256xf32>
    %cst_24 = arith.constant 0.000000e+00 : f32
    %74 = vector.broadcast %cst_24 : f32 to vector<21x256xf32>
    %75 = arith.maximumf %73, %74 : vector<21x256xf32>
    %76 = math.absf %73 : vector<21x256xf32>
    %cst_25 = arith.constant 0.000000e+00 : f32
    %77 = vector.broadcast %cst_25 : f32 to vector<21x256xf32>
    %78 = arith.subf %77, %76 : vector<21x256xf32>
    %79 = math.exp %78 : vector<21x256xf32>
    %80 = math.log1p %79 : vector<21x256xf32>
    %81 = arith.addf %75, %80 : vector<21x256xf32>
    %82 = vector.extract_strided_slice %73 {offsets = [0, 0], sizes = [1, 256], strides = [1, 1]} : vector<21x256xf32> to vector<1x256xf32>
    %83 = vector.extract_strided_slice %81 {offsets = [0, 0], sizes = [1, 256], strides = [1, 1]} : vector<21x256xf32> to vector<1x256xf32>
    %84 = arith.mulf %82, %9 : vector<1x256xf32>
    %85 = arith.subf %83, %84 : vector<1x256xf32>
    %cst_26 = arith.constant 0.000000e+00 : f32
    %86 = vector.broadcast %cst_26 : f32 to vector<1x256xf32>
    %87 = arith.select %5, %85, %86 : vector<1x256xi1>, vector<1x256xf32>
    %cst_27 = arith.constant dense<0.000000e+00> : vector<1xf32>
    %88 = vector.multi_reduction <add>, %87, %cst_27 [1] : vector<1x256xf32> to vector<1xf32>
    %89 = vector.shape_cast %88 : vector<1xf32> to vector<1x1xf32>
    %cst_28 = arith.constant dense<0.000000e+00> : vector<256xf32>
    %90 = vector.multi_reduction <add>, %81, %cst_28 [0] : vector<21x256xf32> to vector<256xf32>
    %91 = vector.shape_cast %90 : vector<256xf32> to vector<1x256xf32>
    %92 = arith.subf %91, %83 : vector<1x256xf32>
    %93 = tpu.iota {dimensions = array<i32: 0>} : vector<21x256xi32>
    %94 = arith.fptosi %7 : vector<1x256xf32> to vector<1x256xi32>
    %c1_i32 = arith.constant 1 : i32
    %95 = vector.broadcast %c1_i32 : i32 to vector<1x256xi32>
    %96 = arith.addi %94, %95 : vector<1x256xi32>
    %97 = vector.broadcast %96 : vector<1x256xi32> to vector<21x256xi32>
    %98 = arith.cmpi eq, %93, %97 : vector<21x256xi32>
    %cst_29 = arith.constant 0.000000e+00 : f32
    %99 = vector.broadcast %cst_29 : f32 to vector<21x256xf32>
    %100 = arith.select %98, %73, %99 : vector<21x256xi1>, vector<21x256xf32>
    %cst_30 = arith.constant dense<0.000000e+00> : vector<256xf32>
    %101 = vector.multi_reduction <add>, %100, %cst_30 [0] : vector<21x256xf32> to vector<256xf32>
    %102 = vector.shape_cast %101 : vector<256xf32> to vector<1x256xf32>
    %103 = arith.subf %92, %102 : vector<1x256xf32>
    %cst_31 = arith.constant 0.000000e+00 : f32
    %104 = vector.broadcast %cst_31 : f32 to vector<1x256xf32>
    %105 = arith.select %12, %103, %104 : vector<1x256xi1>, vector<1x256xf32>
    %cst_32 = arith.constant dense<0.000000e+00> : vector<1xf32>
    %106 = vector.multi_reduction <add>, %105, %cst_32 [1] : vector<1x256xf32> to vector<1xf32>
    %107 = vector.shape_cast %106 : vector<1xf32> to vector<1x1xf32>
    %cst_33 = arith.constant 1.000000e+00 : f32
    %cst_34 = arith.constant 0.000000e+00 : f32
    %108 = vector.broadcast %cst_33 : f32 to vector<1x256xf32>
    %109 = vector.broadcast %cst_34 : f32 to vector<1x256xf32>
    %110 = arith.select %12, %108, %109 : vector<1x256xi1>, vector<1x256xf32>
    %cst_35 = arith.constant dense<0.000000e+00> : vector<1xf32>
    %111 = vector.multi_reduction <add>, %110, %cst_35 [1] : vector<1x256xf32> to vector<1xf32>
    %112 = vector.shape_cast %111 : vector<1xf32> to vector<1x1xf32>
    %113 = tpu.iota {dimensions = array<i32: 1>} : vector<1x128xi32>
    %c0_i32 = arith.constant 0 : i32
    %114 = vector.broadcast %c0_i32 : i32 to vector<1x128xi32>
    %115 = arith.cmpi eq, %113, %114 : vector<1x128xi32>
    %cst_36 = arith.constant 0.000000e+00 : f32
    %116 = vector.shape_cast %72 : vector<1x1xf32> to vector<1x1xf32>
    %117 = vector.broadcast %116 : vector<1x1xf32> to vector<1x128xf32>
    %118 = vector.broadcast %cst_36 : f32 to vector<1x128xf32>
    %119 = arith.select %115, %117, %118 : vector<1x128xi1>, vector<1x128xf32>
    %c1_i32_37 = arith.constant 1 : i32
    %120 = vector.broadcast %c1_i32_37 : i32 to vector<1x128xi32>
    %121 = arith.cmpi eq, %113, %120 : vector<1x128xi32>
    %cst_38 = arith.constant 0.000000e+00 : f32
    %122 = vector.shape_cast %89 : vector<1x1xf32> to vector<1x1xf32>
    %123 = vector.broadcast %122 : vector<1x1xf32> to vector<1x128xf32>
    %124 = vector.broadcast %cst_38 : f32 to vector<1x128xf32>
    %125 = arith.select %121, %123, %124 : vector<1x128xi1>, vector<1x128xf32>
    %126 = arith.addf %119, %125 : vector<1x128xf32>
    %c2_i32 = arith.constant 2 : i32
    %127 = vector.broadcast %c2_i32 : i32 to vector<1x128xi32>
    %128 = arith.cmpi eq, %113, %127 : vector<1x128xi32>
    %cst_39 = arith.constant 0.000000e+00 : f32
    %129 = vector.shape_cast %107 : vector<1x1xf32> to vector<1x1xf32>
    %130 = vector.broadcast %129 : vector<1x1xf32> to vector<1x128xf32>
    %131 = vector.broadcast %cst_39 : f32 to vector<1x128xf32>
    %132 = arith.select %128, %130, %131 : vector<1x128xi1>, vector<1x128xf32>
    %133 = arith.addf %126, %132 : vector<1x128xf32>
    %c3_i32 = arith.constant 3 : i32
    %134 = vector.broadcast %c3_i32 : i32 to vector<1x128xi32>
    %135 = arith.cmpi eq, %113, %134 : vector<1x128xi32>
    %cst_40 = arith.constant 0.000000e+00 : f32
    %136 = vector.shape_cast %112 : vector<1x1xf32> to vector<1x1xf32>
    %137 = vector.broadcast %136 : vector<1x1xf32> to vector<1x128xf32>
    %138 = vector.broadcast %cst_40 : f32 to vector<1x128xf32>
    %139 = arith.select %135, %137, %138 : vector<1x128xi1>, vector<1x128xf32>
    %140 = arith.addf %133, %139 : vector<1x128xf32>
    %c0_41 = arith.constant 0 : index
    %c0_42 = arith.constant 0 : index
    %c0_43 = arith.constant 0 : index
    %141 = vector.load %arg3[%c0_41, %c0_42, %c0_43] : memref<1x1x128xf32, #tpu.memory_space<vmem>>, vector<1x1x128xf32>
    %142 = vector.shape_cast %141 : vector<1x1x128xf32> to vector<1x128xf32>
    %143 = vector.shape_cast %140 : vector<1x128xf32> to vector<1x1x128xf32>
    tpu.vector_store %arg3[%c0_41, %c0_42, %c0_43], %143 {strides = array<i32>} : memref<1x1x128xf32, #tpu.memory_space<vmem>>, vector<1x1x128xf32>,
    return
  }
  func.func @transform_0(%arg0: i32) -> (i32, i32) {
    %c0_i32 = arith.constant 0 : i32
    %c0_i32_0 = arith.constant 0 : i32
    return %c0_i32, %arg0 : i32, i32
  }
  func.func @transform_1(%arg0: i32) -> (i32, i32) {
    %c0_i32 = arith.constant 0 : i32
    %c0_i32_0 = arith.constant 0 : i32
    return %c0_i32, %arg0 : i32, i32
  }
  func.func @transform_2(%arg0: i32) -> (i32, i32, i32) {
    %c0_i32 = arith.constant 0 : i32
    %c0_i32_0 = arith.constant 0 : i32
    %c0_i32_1 = arith.constant 0 : i32
    return %arg0, %c0_i32, %c0_i32_0 : i32, i32, i32
  }
}

</mosaic_0001>

<bundles_post_ra>
// kernel: yolov8_loss.1
= control target key start
LH: loop header
LB: loop body
LE: loop exit
PB: predicated region body
PF: predicated region fallthrough
CT: control target
= control target key end

     0   :  { %s2361_s9 = smov 0   ;;  %s2363_s10 = smov 0   ;;  %s3408_s0 = inlined_call_operand.vmem [shape: f32[85,288], index: 0, kind: input, shape index: {}]   ;;  %s3409_s1 = inlined_call_operand.vmem [shape: f32[6,288], index: 1, kind: input, shape index: {}]   ;;  %s3410_s2 = inlined_call_operand.vmem [shape: f32[2,1,128], index: 2, kind: output, shape index: {}]  }
   0x1   :  { %s2365_s11 = smov 0  }
   0x2 LB: > { %s2377_s12 = sadd.s32 4294967295, %s2276_s11   ;;  %s2380_s13 = sadd.s32 1, %s2276_s11   ;;  %s2276_s11 = sphi %s2365_s11, %s3507_s11   ;;  %s2272_s10 = sphi %s2363_s10, %s3506_s10   ;;  %s2268_s9 = sphi %s2361_s9, %s3505_s9  }
   0x3   : > { %s16_s14 = ssub.s32 %s2276_s11, %s2380_s13  ;;  %s19_s15 = sadd.s32 1, %s2272_s10 }
   0x4   : > { %p17_p0 = scmp.eq.s32.totalorder %s16_s14, 0  ;;  %p26_p1 = scmp.ne.s32.totalorder %s2272_s10, %s2268_s9 }
   0x5   : > { %p27_p2 = scmp.eq.s32.totalorder %s2276_s11, 0  ;;  %p1877_p4 = scmp.ge.s32.totalorder %s2276_s11, 2 }
   0x6   : > { %s2389_s16 = scalar_select %p17_p0, %s2272_s10, %s19_s15  }
   0x7   : > { %p28_p3 = por %p27_p2, %p26_p1  ;;  %104 = sbr.rel (%p1877_p4) target bundleno = 150 (0x96), region = 16 }
   0xc   : > { %107 = sbr.rel (!%p28_p3) target bundleno = 150 (0x96), region = 20  ;;  %s109_s17 = sand.u32 (%p28_p3), 1, %s2272_s10  }
   0xd   : > { %s1878_s18 = sshll.u32 (%p28_p3), %s2276_s11, 1  ;;  %s1916_s19 = smul.u32 (%p28_p3), 176, %s109_s17 }
   0xe   : > { %s113_s20 = ssub.s32 (%p28_p3), 3, %s1878_s18  ;;  %s1911_s21 = sshll.u32 (%p28_p3), %s2276_s11, 4 }
   0xf   : > { %p114_p5 = scmp.lt.s32.totalorder (%p28_p3), %s113_s20, 2  ;;  %s2398_s24 = scalar_lea.vmem (%p28_p3), %s3408_s0, %s1911_s21  }
  0x10   : > { %s2402_s27 = scalar_lea.vmem (%p28_p3), [#allocation2], %s1916_s19  }
  0x11   : > { %s3509_s20 = smov (!%p114_p5, %s113_s20), 2 }
  0x12   : > { %s116_s25 = smul.u32 1408, %s3509_s20  ;;  %s2400_s26 = sshll.u32 %s3509_s20, 3 }
  0x14   : > { %p1882_p6 = scmp.eq.s32.totalorder %s116_s25, 0 }
  0x15   : > { %p124_p7 = scmp.lt.u32.totalorder (!%p1882_p6), %s2400_s26, 8 }
  0x16   : > { %123 = sbr.rel (%p1882_p6) target bundleno = 150 (0x96), region = 24 }
  0x1b   : > { %127 = sbr.rel (%p124_p7) target bundleno = 131 (0x83), region = 28  ;;  %s2406_s28 = sand.u32 (!%p124_p7), 7, %s2400_s26  }
  0x1c   : > { %p164_p8 = scmp.eq.s32.totalorder (!%p124_p7), %s2406_s28, 0  ;;  %p1883_p9 = scmp.ne.s32.totalorder (!%p124_p7), %s2406_s28, 0 }
  0x20   : > { %167 = sbr.rel (%p1883_p9) target bundleno = 74 (0x4a), region = 43  ;;  %s168_s29 = sshrl.u32 (!%p1883_p9), %s2400_s26, 3 }
  0x21   : > { %s2413_s30 = sshrl.u32 (!%p1883_p9), %s168_s29, 3 }
  0x22   : > { %p1884_p10 = scmp.le.s32.totalorder (!%p1883_p9), %s2413_s30, 0 }
  0x25   : > { %1797 = sbr.rel (%p1884_p10) target bundleno = 58 (0x3a), region = 144  ;;  %s3431_s3 = smov (!%p1884_p10), %s2402_s27 }
  0x26   : > { %s3432_s4 = smov (!%p1884_p10), %s2398_s24  ;;  %s2422_s5 = smov (!%p1884_p10), 0  }
  0x27   : > { %s2424_s6 = smov (!%p1884_p10), 0  }
  0x2a LB: >> { %v321_v0 = vld [vmem:[%s2284_s4 + $0xf0] sm:$0xff]  ;;  %v323_v1 = vld [vmem:[%s2284_s4 + $0xf8] sm:$0xff]  ;;  %v219_v4 = vld [vmem:[%s2284_s4 + $0x48] sm:$0xff]  ;;  %s357_s7 = sadd.s32 1, %s2288_s5  ;;  %s175_s6 = sadd.s32 1, %s2292_s6   ;;  %s2292_s6 = sphi %s2424_s6, %s175_s6   ;;  %s2288_s5 = sphi %s2422_s5, %s3435_s5   ;;  %s2284_s4 = sphi %s3432_s4, %s3434_s4   ;;  %s2280_s3 = sphi %s3431_s3, %s3433_s3  }
  0x2b   : >> { %v187_v2 = vld [vmem:[%s2284_s4 + $0x18] sm:$0xff]  ;;  %v203_v3 = vld [vmem:[%s2284_s4 + $0x30] sm:$0xff]  ;;  %v235_v5 = vld [vmem:[%s2284_s4 + $0x60] sm:$0xff]  ;;  %342 = vst [vmem:[%s2280_s3 + $0xa0] sm:$0xff] %v321_v0  ;;  %p358_p11 = scmp.ge.s32.totalorder %s357_s7, %s2413_s30  ;;  %p174_p12 = scmp.ge.s32.totalorder %s175_s6, %s2413_s30 }
  0x2c   : >> { %198 = vst [vmem:[%s2280_s3 + $0x10] sm:$0xff] %v187_v2  ;;  %344 = vst [vmem:[%s2280_s3 + $0xa8] sm:$0xff] %v323_v1  ;;  %v251_v6 = vld [vmem:[%s2284_s4 + $0x78] sm:$0xff]  ;;  %v267_v7 = vld [vmem:[%s2284_s4 + $0x90] sm:$0xff] }
  0x2d   : >> { %v283_v8 = vld [vmem:[%s2284_s4 + $0xa8] sm:$0xff]  ;;  %214 = vst [vmem:[%s2280_s3 + $0x20] sm:$0xff] %v203_v3  ;;  %230 = vst [vmem:[%s2280_s3 + $0x30] sm:$0xff] %v219_v4  ;;  %v299_v9 = vld [vmem:[%s2284_s4 + $0xc0] sm:$0xff]  ;;  %s3511_s7 = smov (%p358_p11, %s357_s7), 0 }
  0x2e   : >> { %246 = vst [vmem:[%s2280_s3 + $0x40] sm:$0xff] %v235_v5  ;;  %v315_v10 = vld [vmem:[%s2284_s4 + $0xd8] sm:$0xff]  ;;  %v335_v11 = vld [vmem:[%s2284_s4 + $0x100] sm:$0xff]  ;;  %262 = vst [vmem:[%s2280_s3 + $0x50] sm:$0xff] %v251_v6  ;;  %s1885_s8 = sshll.u32 %s3511_s7, 6  ;;  %s3435_s5 = smov %s3511_s7 }
  0x2f   : >> { %278 = vst [vmem:[%s2280_s3 + $0x60] sm:$0xff] %v267_v7  ;;  %294 = vst [vmem:[%s2280_s3 + $0x70] sm:$0xff] %v283_v8  ;;  %v337_v12 = vld [vmem:[%s2284_s4 + $0x108] sm:$0xff]  ;;  %v339_v13 = vld [vmem:[%s2284_s4 + $0x110] sm:$0xff]  ;;  %s362_s14 = scalar_lea.vmem %s2398_s24, %s1885_s8   ;;  %s363_s15 = scalar_lea.vmem %s2402_s27, %s1885_s8 [#allocation2]  }
  0x30   : >> { %v181_v14 = vld [vmem:[%s2284_s4] sm:$0xff]  ;;  %310 = vst [vmem:[%s2280_s3 + $0x80] sm:$0xff] %v299_v9  ;;  %326 = vst [vmem:[%s2280_s3 + $0x90] sm:$0xff] %v315_v10  ;;  %v183_v15 = vld [vmem:[%s2284_s4 + $0x8] sm:$0xff] }
  0x31   : >> { %346 = vst [vmem:[%s2280_s3 + $0xb0] sm:$0xff] %v335_v11  ;;  %182 = vst [vmem:[%s2280_s3] sm:$0xff] %v181_v14  ;;  %v199_v16 = vld [vmem:[%s2284_s4 + $0x20] sm:$0xff]  ;;  %v215_v17 = vld [vmem:[%s2284_s4 + $0x38] sm:$0xff] }
  0x32   : >> { %348 = vst [vmem:[%s2280_s3 + $0xb8] sm:$0xff] %v337_v12  ;;  %350 = vst [vmem:[%s2280_s3 + $0xc0] sm:$0xff] %v339_v13  ;;  %v231_v18 = vld [vmem:[%s2284_s4 + $0x50] sm:$0xff]  ;;  %v247_v19 = vld [vmem:[%s2284_s4 + $0x68] sm:$0xff] }
  0x33   : >> { %184 = vst [vmem:[%s2280_s3 + $0x8] sm:$0xff] %v183_v15  ;;  %200 = vst [vmem:[%s2280_s3 + $0x18] sm:$0xff] %v199_v16  ;;  %v263_v20 = vld [vmem:[%s2284_s4 + $0x80] sm:$0xff]  ;;  %v279_v21 = vld [vmem:[%s2284_s4 + $0x98] sm:$0xff] }
  0x34   : >> { %216 = vst [vmem:[%s2280_s3 + $0x28] sm:$0xff] %v215_v17  ;;  %232 = vst [vmem:[%s2280_s3 + $0x38] sm:$0xff] %v231_v18  ;;  %v295_v22 = vld [vmem:[%s2284_s4 + $0xb0] sm:$0xff]  ;;  %v311_v23 = vld [vmem:[%s2284_s4 + $0xc8] sm:$0xff] }
  0x35   : >> { %248 = vst [vmem:[%s2280_s3 + $0x48] sm:$0xff] %v247_v19  ;;  %264 = vst [vmem:[%s2280_s3 + $0x58] sm:$0xff] %v263_v20  ;;  %v327_v24 = vld [vmem:[%s2284_s4 + $0xe0] sm:$0xff]  ;;  %v351_v25 = vld [vmem:[%s2284_s4 + $0x118] sm:$0xff]  ;;  %177 = sbr.rel (!%p174_p12) target bundleno = 42 (0x2a), region = 150 }
  0x36   : >> { %280 = vst [vmem:[%s2280_s3 + $0x68] sm:$0xff] %v279_v21  ;;  %296 = vst [vmem:[%s2280_s3 + $0x78] sm:$0xff] %v295_v22  ;;  %v353_v26 = vld [vmem:[%s2284_s4 + $0x120] sm:$0xff]  ;;  %v355_v27 = vld [vmem:[%s2284_s4 + $0x128] sm:$0xff]  ;;  %s3434_s4 = smov %s362_s14 }
  0x37   : >> { %312 = vst [vmem:[%s2280_s3 + $0x88] sm:$0xff] %v311_v23  ;;  %328 = vst [vmem:[%s2280_s3 + $0x98] sm:$0xff] %v327_v24 }
  0x38   : >> { %352 = vst [vmem:[%s2280_s3 + $0xc8] sm:$0xff] %v351_v25  ;;  %354 = vst [vmem:[%s2280_s3 + $0xd0] sm:$0xff] %v353_v26 }
  0x39   : >> { %356 = vst [vmem:[%s2280_s3 + $0xd8] sm:$0xff] %v355_v27  ;;  %s3433_s3 = smov %s363_s15 }
  0x3a PF: > { %s2514_s17 = sand.u32 7, %s168_s29   ;;  %s1912_s18 = sshll.u32 %s2413_s30, 10 }
  0x3b   : > { %s368_s19 = sshra.s32 %s1912_s18, 4  ;;  %p1890_p13 = scmp.le.s32.totalorder %s2514_s17, 0 }
  0x3c   : > { %s2518_s20 = scalar_lea.vmem %s2398_s24, %s368_s19   ;;  %s2521_s21 = scalar_lea.vmem %s2402_s27, %s368_s19 [#allocation2]  }
  0x3d   : > { %1811 = sbr.rel (%p1890_p13) target bundleno = 74 (0x4a), region = 155  ;;  %s3436_s22 = smov (!%p1890_p13), %s2521_s21 }
  0x3e   : > { %s3437_s23 = smov (!%p1890_p13), %s2518_s20  ;;  %s2530_s25 = smov (!%p1890_p13), 0  }
  0x3f   : > { %s2532_s3 = smov (!%p1890_p13), 0  }
  0x42 LB: >> { %v384_v28 = vld [vmem:[%s2300_s23] sm:$0xff]  ;;  %v386_v29 = vld [vmem:[%s2300_s23 + $0x18] sm:$0xff]  ;;  %v388_v30 = vld [vmem:[%s2300_s23 + $0x30] sm:$0xff]  ;;  %s406_s29 = sadd.s32 1, %s2304_s25  ;;  %s378_s3 = sadd.s32 1, %s2308_s3   ;;  %s2308_s3 = sphi %s2532_s3, %s378_s3   ;;  %s2304_s25 = sphi %s2530_s25, %s3438_s25   ;;  %s2300_s23 = sphi %s3437_s23, %s411_s23   ;;  %s2296_s22 = sphi %s3436_s22, %s412_s22  }
  0x43   : >> { %385 = vst [vmem:[%s2296_s22] sm:$0xff] %v384_v28  ;;  %387 = vst [vmem:[%s2296_s22 + $0x10] sm:$0xff] %v386_v29  ;;  %v390_v31 = vld [vmem:[%s2300_s23 + $0x48] sm:$0xff]  ;;  %v392_v32 = vld [vmem:[%s2300_s23 + $0x60] sm:$0xff]  ;;  %p407_p0 = scmp.ge.s32.totalorder %s406_s29, %s2514_s17  ;;  %p377_p1 = scmp.ge.s32.totalorder %s378_s3, %s2514_s17 }
  0x44   : >> { %389 = vst [vmem:[%s2296_s22 + $0x20] sm:$0xff] %v388_v30  ;;  %v394_v33 = vld [vmem:[%s2300_s23 + $0x78] sm:$0xff]  ;;  %391 = vst [vmem:[%s2296_s22 + $0x30] sm:$0xff] %v390_v31  ;;  %v396_v34 = vld [vmem:[%s2300_s23 + $0x90] sm:$0xff] }
  0x45   : >> { %393 = vst [vmem:[%s2296_s22 + $0x40] sm:$0xff] %v392_v32  ;;  %395 = vst [vmem:[%s2296_s22 + $0x50] sm:$0xff] %v394_v33  ;;  %v398_v35 = vld [vmem:[%s2300_s23 + $0xa8] sm:$0xff]  ;;  %v400_v36 = vld [vmem:[%s2300_s23 + $0xc0] sm:$0xff]  ;;  %s3513_s29 = smov (%p407_p0, %s406_s29), 0  ;;  %380 = sbr.rel (!%p377_p1) target bundleno = 66 (0x42), region = 161 }
  0x46   : >> { %397 = vst [vmem:[%s2296_s22 + $0x60] sm:$0xff] %v396_v34  ;;  %399 = vst [vmem:[%s2296_s22 + $0x70] sm:$0xff] %v398_v35  ;;  %v402_v37 = vld [vmem:[%s2300_s23 + $0xd8] sm:$0xff]  ;;  %v404_v38 = vld [vmem:[%s2300_s23 + $0xf0] sm:$0xff]  ;;  %s1891_s30 = sshll.u32 %s3513_s29, 3  ;;  %s3438_s25 = smov %s3513_s29 }
  0x47   : >> { %401 = vst [vmem:[%s2296_s22 + $0x80] sm:$0xff] %v400_v36  ;;  %403 = vst [vmem:[%s2296_s22 + $0x90] sm:$0xff] %v402_v37  ;;  %s411_s23 = scalar_lea.vmem %s2518_s20, %s1891_s30  }
  0x48   : >> { %405 = vst [vmem:[%s2296_s22 + $0xa0] sm:$0xff] %v404_v38  ;;  %s412_s22 = scalar_lea.vmem %s2521_s21, %s1891_s30 [#allocation2]  }
  0x4a PF: > { %415 = sbr.rel (%p164_p8) target bundleno = 131 (0x83), region = 61  ;;  %s417_s4 = ssub.s32 (!%p164_p8), %s2400_s26, %s2406_s28 }
  0x4b   : > { %s421_s5 = sshrl.u32 (!%p164_p8), %s2400_s26, 3  ;;  %s2559_s6 = scalar_lea.vmem (!%p164_p8), %s2398_s24, %s417_s4 }
  0x4c   : > { %s2562_s7 = scalar_lea.vmem (!%p164_p8), %s2402_s27, %s417_s4 [#allocation2]  ;;  %s2566_s8 = sshrl.u32 (!%p164_p8), %s421_s5, 3 }
  0x4d   : > { %p1893_p2 = scmp.le.s32.totalorder (!%p164_p8), %s2566_s8, 0 }
  0x4f   : > { %1825 = sbr.rel (%p1893_p2) target bundleno = 100 (0x64), region = 166  ;;  %s3439_s14 = smov (!%p1893_p2), %s2402_s27 }
  0x50   : > { %s3440_s15 = smov (!%p1893_p2), %s2398_s24  ;;  %s2575_s17 = smov (!%p1893_p2), 0  }
  0x51   : > { %s2577_s18 = smov (!%p1893_p2), 0  }
  0x54 LB: >> { %v574_v39 = vld [vmem:[%s2316_s15 + $0xf0] sm:$0xff]  ;;  %v576_v40 = vld [vmem:[%s2316_s15 + $0xf8] sm:$0xff]  ;;  %v472_v43 = vld [vmem:[%s2316_s15 + $0x48] sm:$0xff]  ;;  %s610_s19 = sadd.s32 1, %s2320_s17  ;;  %s428_s18 = sadd.s32 1, %s2324_s18   ;;  %s2324_s18 = sphi %s2577_s18, %s428_s18   ;;  %s2320_s17 = sphi %s2575_s17, %s3443_s17   ;;  %s2316_s15 = sphi %s3440_s15, %s3442_s15   ;;  %s2312_s14 = sphi %s3439_s14, %s3441_s14  }
  0x55   : >> { %v440_v41 = vld [vmem:[%s2316_s15 + $0x18] sm:$0xff]  ;;  %v456_v42 = vld [vmem:[%s2316_s15 + $0x30] sm:$0xff]  ;;  %v488_v44 = vld [vmem:[%s2316_s15 + $0x60] sm:$0xff]  ;;  %595 = vst [vmem:[%s2312_s14 + $0xa0] sm:$0xff] %v574_v39  ;;  %p611_p3 = scmp.ge.s32.totalorder %s610_s19, %s2566_s8  ;;  %p427_p4 = scmp.ge.s32.totalorder %s428_s18, %s2566_s8 }
  0x56   : >> { %451 = vst [vmem:[%s2312_s14 + $0x10] sm:$0xff] %v440_v41  ;;  %597 = vst [vmem:[%s2312_s14 + $0xa8] sm:$0xff] %v576_v40  ;;  %v504_v45 = vld [vmem:[%s2316_s15 + $0x78] sm:$0xff]  ;;  %v520_v46 = vld [vmem:[%s2316_s15 + $0x90] sm:$0xff] }
  0x57   : >> { %v536_v47 = vld [vmem:[%s2316_s15 + $0xa8] sm:$0xff]  ;;  %467 = vst [vmem:[%s2312_s14 + $0x20] sm:$0xff] %v456_v42  ;;  %483 = vst [vmem:[%s2312_s14 + $0x30] sm:$0xff] %v472_v43  ;;  %v552_v48 = vld [vmem:[%s2316_s15 + $0xc0] sm:$0xff]  ;;  %s3515_s19 = smov (%p611_p3, %s610_s19), 0 }
  0x58   : >> { %499 = vst [vmem:[%s2312_s14 + $0x40] sm:$0xff] %v488_v44  ;;  %v568_v49 = vld [vmem:[%s2316_s15 + $0xd8] sm:$0xff]  ;;  %v588_v50 = vld [vmem:[%s2316_s15 + $0x100] sm:$0xff]  ;;  %515 = vst [vmem:[%s2312_s14 + $0x50] sm:$0xff] %v504_v45  ;;  %s1894_s20 = sshll.u32 %s3515_s19, 6  ;;  %s3443_s17 = smov %s3515_s19 }
  0x59   : >> { %531 = vst [vmem:[%s2312_s14 + $0x60] sm:$0xff] %v520_v46  ;;  %547 = vst [vmem:[%s2312_s14 + $0x70] sm:$0xff] %v536_v47  ;;  %v590_v51 = vld [vmem:[%s2316_s15 + $0x108] sm:$0xff]  ;;  %v592_v52 = vld [vmem:[%s2316_s15 + $0x110] sm:$0xff]  ;;  %s615_s21 = scalar_lea.vmem %s2398_s24, %s1894_s20   ;;  %s616_s22 = scalar_lea.vmem %s2402_s27, %s1894_s20 [#allocation2]  }
  0x5a   : >> { %v434_v53 = vld [vmem:[%s2316_s15] sm:$0xff]  ;;  %563 = vst [vmem:[%s2312_s14 + $0x80] sm:$0xff] %v552_v48  ;;  %579 = vst [vmem:[%s2312_s14 + $0x90] sm:$0xff] %v568_v49  ;;  %v436_v54 = vld [vmem:[%s2316_s15 + $0x8] sm:$0xff] }
  0x5b   : >> { %599 = vst [vmem:[%s2312_s14 + $0xb0] sm:$0xff] %v588_v50  ;;  %435 = vst [vmem:[%s2312_s14] sm:$0xff] %v434_v53  ;;  %v452_v55 = vld [vmem:[%s2316_s15 + $0x20] sm:$0xff]  ;;  %v468_v56 = vld [vmem:[%s2316_s15 + $0x38] sm:$0xff] }
  0x5c   : >> { %601 = vst [vmem:[%s2312_s14 + $0xb8] sm:$0xff] %v590_v51  ;;  %603 = vst [vmem:[%s2312_s14 + $0xc0] sm:$0xff] %v592_v52  ;;  %v484_v57 = vld [vmem:[%s2316_s15 + $0x50] sm:$0xff]  ;;  %v500_v58 = vld [vmem:[%s2316_s15 + $0x68] sm:$0xff] }
  0x5d   : >> { %437 = vst [vmem:[%s2312_s14 + $0x8] sm:$0xff] %v436_v54  ;;  %453 = vst [vmem:[%s2312_s14 + $0x18] sm:$0xff] %v452_v55  ;;  %v516_v59 = vld [vmem:[%s2316_s15 + $0x80] sm:$0xff]  ;;  %v532_v60 = vld [vmem:[%s2316_s15 + $0x98] sm:$0xff] }
  0x5e   : >> { %469 = vst [vmem:[%s2312_s14 + $0x28] sm:$0xff] %v468_v56  ;;  %485 = vst [vmem:[%s2312_s14 + $0x38] sm:$0xff] %v484_v57  ;;  %v548_v61 = vld [vmem:[%s2316_s15 + $0xb0] sm:$0xff]  ;;  %v564_v62 = vld [vmem:[%s2316_s15 + $0xc8] sm:$0xff] }
  0x5f   : >> { %501 = vst [vmem:[%s2312_s14 + $0x48] sm:$0xff] %v500_v58  ;;  %517 = vst [vmem:[%s2312_s14 + $0x58] sm:$0xff] %v516_v59  ;;  %v580_v63 = vld [vmem:[%s2316_s15 + $0xe0] sm:$0xff]  ;;  %v604_v0 = vld [vmem:[%s2316_s15 + $0x118] sm:$0xff]  ;;  %430 = sbr.rel (!%p427_p4) target bundleno = 84 (0x54), region = 172 }
  0x60   : >> { %533 = vst [vmem:[%s2312_s14 + $0x68] sm:$0xff] %v532_v60  ;;  %549 = vst [vmem:[%s2312_s14 + $0x78] sm:$0xff] %v548_v61  ;;  %v606_v1 = vld [vmem:[%s2316_s15 + $0x120] sm:$0xff]  ;;  %v608_v2 = vld [vmem:[%s2316_s15 + $0x128] sm:$0xff]  ;;  %s3442_s15 = smov %s615_s21 }
  0x61   : >> { %565 = vst [vmem:[%s2312_s14 + $0x88] sm:$0xff] %v564_v62  ;;  %581 = vst [vmem:[%s2312_s14 + $0x98] sm:$0xff] %v580_v63 }
  0x62   : >> { %605 = vst [vmem:[%s2312_s14 + $0xc8] sm:$0xff] %v604_v0  ;;  %607 = vst [vmem:[%s2312_s14 + $0xd0] sm:$0xff] %v606_v1 }
  0x63   : >> { %609 = vst [vmem:[%s2312_s14 + $0xd8] sm:$0xff] %v608_v2  ;;  %s3441_s14 = smov %s616_s22 }
  0x64 PF: > { %s2667_s23 = sand.u32 7, %s421_s5   ;;  %s1914_s25 = sshll.u32 %s2566_s8, 10 }
  0x65   : > { %s621_s3 = sshra.s32 %s1914_s25, 4  ;;  %p1899_p5 = scmp.le.s32.totalorder %s2667_s23, 0 }
  0x66   : > { %s2671_s29 = scalar_lea.vmem %s2398_s24, %s621_s3   ;;  %s2674_s30 = scalar_lea.vmem %s2402_s27, %s621_s3 [#allocation2]  }
  0x67   : > { %1839 = sbr.rel (%p1899_p5) target bundleno = 116 (0x74), region = 177  ;;  %s3444_s4 = smov (!%p1899_p5), %s2674_s30 }
  0x68   : > { %s3445_s14 = smov (!%p1899_p5), %s2671_s29  ;;  %s2683_s15 = smov (!%p1899_p5), 0  }
  0x69   : > { %s2685_s17 = smov (!%p1899_p5), 0  }
  0x6c LB: >> { %v637_v3 = vld [vmem:[%s2332_s14] sm:$0xff]  ;;  %v639_v4 = vld [vmem:[%s2332_s14 + $0x18] sm:$0xff]  ;;  %v641_v5 = vld [vmem:[%s2332_s14 + $0x30] sm:$0xff]  ;;  %s659_s5 = sadd.s32 1, %s2336_s15  ;;  %s631_s17 = sadd.s32 1, %s2340_s17   ;;  %s2340_s17 = sphi %s2685_s17, %s631_s17   ;;  %s2336_s15 = sphi %s2683_s15, %s3446_s15   ;;  %s2332_s14 = sphi %s3445_s14, %s664_s14   ;;  %s2328_s4 = sphi %s3444_s4, %s665_s4  }
  0x6d   : >> { %638 = vst [vmem:[%s2328_s4] sm:$0xff] %v637_v3  ;;  %640 = vst [vmem:[%s2328_s4 + $0x10] sm:$0xff] %v639_v4  ;;  %v643_v6 = vld [vmem:[%s2332_s14 + $0x48] sm:$0xff]  ;;  %v645_v7 = vld [vmem:[%s2332_s14 + $0x60] sm:$0xff]  ;;  %p660_p6 = scmp.ge.s32.totalorder %s659_s5, %s2667_s23  ;;  %p630_p7 = scmp.ge.s32.totalorder %s631_s17, %s2667_s23 }
  0x6e   : >> { %642 = vst [vmem:[%s2328_s4 + $0x20] sm:$0xff] %v641_v5  ;;  %v647_v8 = vld [vmem:[%s2332_s14 + $0x78] sm:$0xff]  ;;  %644 = vst [vmem:[%s2328_s4 + $0x30] sm:$0xff] %v643_v6  ;;  %v649_v9 = vld [vmem:[%s2332_s14 + $0x90] sm:$0xff] }
  0x6f   : >> { %646 = vst [vmem:[%s2328_s4 + $0x40] sm:$0xff] %v645_v7  ;;  %648 = vst [vmem:[%s2328_s4 + $0x50] sm:$0xff] %v647_v8  ;;  %v651_v10 = vld [vmem:[%s2332_s14 + $0xa8] sm:$0xff]  ;;  %v653_v11 = vld [vmem:[%s2332_s14 + $0xc0] sm:$0xff]  ;;  %s3517_s5 = smov (%p660_p6, %s659_s5), 0  ;;  %633 = sbr.rel (!%p630_p7) target bundleno = 108 (0x6c), region = 183 }
  0x70   : >> { %650 = vst [vmem:[%s2328_s4 + $0x60] sm:$0xff] %v649_v9  ;;  %652 = vst [vmem:[%s2328_s4 + $0x70] sm:$0xff] %v651_v10  ;;  %v655_v12 = vld [vmem:[%s2332_s14 + $0xd8] sm:$0xff]  ;;  %v657_v13 = vld [vmem:[%s2332_s14 + $0xf0] sm:$0xff]  ;;  %s1900_s8 = sshll.u32 %s3517_s5, 3  ;;  %s3446_s15 = smov %s3517_s5 }
  0x71   : >> { %654 = vst [vmem:[%s2328_s4 + $0x80] sm:$0xff] %v653_v11  ;;  %656 = vst [vmem:[%s2328_s4 + $0x90] sm:$0xff] %v655_v12  ;;  %s664_s14 = scalar_lea.vmem %s2671_s29, %s1900_s8  }
  0x72   : >> { %658 = vst [vmem:[%s2328_s4 + $0xa0] sm:$0xff] %v657_v13  ;;  %s665_s4 = scalar_lea.vmem %s2674_s30, %s1900_s8 [#allocation2]  }
  0x74 PF: > { %s2342_s18 = smov 1  }
  0x75   : > { %s666_s19 = sshll.u32 %s2342_s18, %s2406_s28 }
  0x76   : > { %s1902_s20 = sadd.s32 4294967295, %s666_s19 }
  0x77   : > { %v676_v14 = vld [vmem:[%s2559_s6] sm:%s1902_s20]  ;;  %v678_v15 = vld [vmem:[%s2559_s6 + $0x18] sm:%s1902_s20] }
  0x78   : > { %677 = vst [vmem:[%s2562_s7] sm:%s1902_s20] %v676_v14  ;;  %679 = vst [vmem:[%s2562_s7 + $0x10] sm:%s1902_s20] %v678_v15 }
  0x79   : > { %v680_v16 = vld [vmem:[%s2559_s6 + $0x30] sm:%s1902_s20]  ;;  %v682_v17 = vld [vmem:[%s2559_s6 + $0x48] sm:%s1902_s20] }
  0x7a   : > { %681 = vst [vmem:[%s2562_s7 + $0x20] sm:%s1902_s20] %v680_v16  ;;  %683 = vst [vmem:[%s2562_s7 + $0x30] sm:%s1902_s20] %v682_v17 }
  0x7b   : > { %v684_v18 = vld [vmem:[%s2559_s6 + $0x60] sm:%s1902_s20]  ;;  %v686_v19 = vld [vmem:[%s2559_s6 + $0x78] sm:%s1902_s20] }
  0x7c   : > { %685 = vst [vmem:[%s2562_s7 + $0x40] sm:%s1902_s20] %v684_v18  ;;  %687 = vst [vmem:[%s2562_s7 + $0x50] sm:%s1902_s20] %v686_v19 }
  0x7d   : > { %v688_v20 = vld [vmem:[%s2559_s6 + $0x90] sm:%s1902_s20]  ;;  %v690_v21 = vld [vmem:[%s2559_s6 + $0xa8] sm:%s1902_s20] }
  0x7e   : > { %689 = vst [vmem:[%s2562_s7 + $0x60] sm:%s1902_s20] %v688_v20  ;;  %691 = vst [vmem:[%s2562_s7 + $0x70] sm:%s1902_s20] %v690_v21 }
  0x7f   : > { %v692_v22 = vld [vmem:[%s2559_s6 + $0xc0] sm:%s1902_s20]  ;;  %v694_v23 = vld [vmem:[%s2559_s6 + $0xd8] sm:%s1902_s20] }
  0x80   : > { %693 = vst [vmem:[%s2562_s7 + $0x80] sm:%s1902_s20] %v692_v22  ;;  %695 = vst [vmem:[%s2562_s7 + $0x90] sm:%s1902_s20] %v694_v23 }
  0x81   : > { %v696_v24 = vld [vmem:[%s2559_s6 + $0xf0] sm:%s1902_s20] }
  0x82   : > { %697 = vst [vmem:[%s2562_s7 + $0xa0] sm:%s1902_s20] %v696_v24 }
  0x83 PF: > { %p1903_p8 = scmp.ge.u32.totalorder %s2400_s26, 8 }
  0x84   : > { %s2343_s28 = smov (!%p1903_p8), 1  }
  0x85   : > { %130 = sbr.rel (%p1903_p8) target bundleno = 150 (0x96), region = 32  ;;  %s131_s6 = sshll.u32 (!%p1903_p8), %s2343_s28, %s2400_s26 }
  0x86   : > { %s1904_s7 = sadd.s32 (!%p1903_p8), 4294967295, %s131_s6 }
  0x8a   : > { %v141_v25 = vld [vmem:[%s2398_s24] sm:%s1904_s7]  ;;  %v143_v26 = vld [vmem:[%s2398_s24 + $0x18] sm:%s1904_s7] }
  0x8b   : > { %142 = vst [vmem:[%s2402_s27] sm:%s1904_s7] %v141_v25  ;;  %144 = vst [vmem:[%s2402_s27 + $0x10] sm:%s1904_s7] %v143_v26 }
  0x8c   : > { %v145_v27 = vld [vmem:[%s2398_s24 + $0x30] sm:%s1904_s7]  ;;  %v147_v28 = vld [vmem:[%s2398_s24 + $0x48] sm:%s1904_s7] }
  0x8d   : > { %146 = vst [vmem:[%s2402_s27 + $0x20] sm:%s1904_s7] %v145_v27  ;;  %148 = vst [vmem:[%s2402_s27 + $0x30] sm:%s1904_s7] %v147_v28 }
  0x8e   : > { %v149_v29 = vld [vmem:[%s2398_s24 + $0x60] sm:%s1904_s7]  ;;  %v151_v30 = vld [vmem:[%s2398_s24 + $0x78] sm:%s1904_s7] }
  0x8f   : > { %150 = vst [vmem:[%s2402_s27 + $0x40] sm:%s1904_s7] %v149_v29  ;;  %152 = vst [vmem:[%s2402_s27 + $0x50] sm:%s1904_s7] %v151_v30 }
  0x90   : > { %v153_v31 = vld [vmem:[%s2398_s24 + $0x90] sm:%s1904_s7]  ;;  %v155_v32 = vld [vmem:[%s2398_s24 + $0xa8] sm:%s1904_s7] }
  0x91   : > { %154 = vst [vmem:[%s2402_s27 + $0x60] sm:%s1904_s7] %v153_v31  ;;  %156 = vst [vmem:[%s2402_s27 + $0x70] sm:%s1904_s7] %v155_v32 }
  0x92   : > { %v157_v33 = vld [vmem:[%s2398_s24 + $0xc0] sm:%s1904_s7]  ;;  %v159_v34 = vld [vmem:[%s2398_s24 + $0xd8] sm:%s1904_s7] }
  0x93   : > { %158 = vst [vmem:[%s2402_s27 + $0x80] sm:%s1904_s7] %v157_v33  ;;  %160 = vst [vmem:[%s2402_s27 + $0x90] sm:%s1904_s7] %v159_v34 }
  0x94   : > { %v161_v35 = vld [vmem:[%s2398_s24 + $0xf0] sm:%s1904_s7] }
  0x95   : > { %162 = vst [vmem:[%s2402_s27 + $0xa0] sm:%s1904_s7] %v161_v35 }
  0x96 PF: > { %p1905_p9 = scmp.ge.s32.totalorder %s2276_s11, 1  ;;  %p717_p10 = scmp.lt.s32.totalorder %s2276_s11, 3 }
  0x98   : > { %p718_p11 = pnand %p1905_p9, %p717_p10 }
  0x9a   : > { %721 = sbr.rel (%p718_p11) target bundleno = 522 (0x20a), region = 90 }
  0x9f   : > { %s724_s26 = sand.u32 1, %s2268_s9   ;;  %s1906_s21 = sshll.u32 %s2377_s12, 1  ;;  %v774_v36 = vlaneseq  ;;  %v2344_v54 = vmov 1966171168   ;;  %vm1627_vm0 = vcmask 1044480   ;;  %vm1620_vm12 = vcmask 1040384  }
  0xa0   : > { %s1917_s22 = smul.u32 176, %s724_s26  ;;  %p762_p12 = scmp.lt.s32.totalorder %s1906_s21, 2  ;;  %v2791_v55 = vunpack.c.l.s4 %v2344_v54 }
  0xa1   : > { %v2757_v37 = vand.u32 127, %v774_v36  ;;  %s1908_s24 = sshll.u32 %s2377_s12, 8  ;;  %v2770_v42 = vshrl.u32 %v774_v36, 7  ;;  %p771_p13 = scmp.lt.s32.totalorder %s2377_s12, 1 }
  0xa2   : > { %s3519_s21 = smov (!%p762_p12, %s1906_s21), 2  ;;  %s2760_s27 = scalar_lea.vmem [#allocation2], %s1917_s22  ;;  %v778_v44 = vstv %s1908_s24 }
  0xa3   : > { %3447 = vst [vmem:[#allocation3_spill] sm:$0xff] %v2757_v37  ;;  %v2763_v38 = vld [vmem:[%s2760_s27 + $0x80] sm:$0xff]  ;;  %v2766_v39 = vld [vmem:[%s2760_s27 + $0x88] sm:$0xff]  ;;  %s1907_s9 = sshll.u32 %s3519_s21, 3  ;;  %3448 = vst [vmem:[#allocation4_spill] sm:$0xff] %v2770_v42  ;;  %v776_v43 = vadd.s32 128, %v2757_v37  ;;  %v2794_v56 = vadd.s32 %v778_v44, %v2757_v37 }
  0xa4   : > { %v1524_v40 = vand.u32 2147483647, %v2763_v38  ;;  %v1525_v41 = vand.u32 2147483647, %v2766_v39  ;;  %s765_s25 = scalar_lea.vmem %s3409_s1, %s1907_s9  ;;  %v2777_v47 = vld [vmem:[%s2760_s27 + $0x90] sm:$0xff]  ;;  %v2780_v48 = vadd.s32 8, %v2770_v42 }
  0xa5   : > { %v2783_v49 = vld [vmem:[%s2760_s27 + $0x98] sm:$0xff]  ;;  %v2786_v50 = vld [vmem:[%s2760_s27 + $0xa0] sm:$0x1f]  ;;  %v2789_v53 = vld [vmem:[%s2760_s27 + $0xa8] sm:$0x1f]  ;;  %v2800_v59 = vsub.s32 0, %v2770_v42  ;;  %v2803_v61 = vadd.s32 %v778_v44, %v776_v43 }
  0xa6   : > { %v1530_v45 = vsub.f32 0.0, %v1524_v40  ;;  %v1531_v46 = vsub.f32 0.0, %v1525_v41  ;;  %3449 = vst [vmem:[#allocation5_spill] sm:$0xff] %v2780_v48  ;;  %v2796_v57 = vld [vmem:[%s765_s25] sm:$0x3f]  ;;  %v2821_v10 = vld [vmem:[%s2760_s27 + $0x8] sm:$0xff] }
  0xa7   : > { %3450 = vst [vmem:[#allocation6_spill] sm:$0xff] %v2800_v59  ;;  %v1526_v60 = vand.u32 2147483647, %v2777_v47  ;;  %v2805_v62 = vld [vmem:[%s765_s25 + $0x8] sm:$0x3f]  ;;  %v2810_v1 = vld [vmem:[%s2760_s27] sm:$0xff]  ;;  %v1926_v8 = vtrunc.f32 %v2796_v57 }
  0xa8   : > { %v1536_v51 = vmul.f32 1.442695, %v1530_v45  ;;  %v1538_v52 = vmul.f32 1.442695, %v1531_v46  ;;  %v1527_v0 = vand.u32 2147483647, %v2783_v49  ;;  %v1928_v9 = vtrunc.f32 %v2805_v62 }
  0xa9   : > { %v1528_v2 = vand.u32 2147483647, %v2786_v50  ;;  %v1529_v3 = vand.u32 2147483647, %v2789_v53  ;;  %v1532_v4 = vsub.f32 0.0, %v1526_v60  ;;  %v2815_v5 = vld [vmem:[%s2760_s27 + $0x10] sm:$0xff]  ;;  %v1927_v17 = vcvt.f32.s32 %v1926_v8 }
  0xaa   : > { %2086 = vpow2.f32 %v1536_v51  ;;  %v1533_v7 = vsub.f32 0.0, %v1527_v0  ;;  %v2824_v11 = vld [vmem:[%s2760_s27 + $0x18] sm:$0xff]  ;;  %v1610_v12 = vrot.slane %v2796_v57, 5  ;;  %v1929_v18 = vcvt.f32.s32 %v1928_v9  ;;  %v2833_v26 = vld [vmem:[%s2760_s27 + $0x20] sm:$0xff]  ;;  %v2836_v27 = vld [vmem:[%s2760_s27 + $0x30] sm:$0xff]  ;;  %s3521_s12 = smov (!%p771_p13, %s2377_s12), 1 }
  0xab   : > { %2088 = vpow2.f32 %v1538_v52  ;;  %v1534_v13 = vsub.f32 0.0, %v1528_v2  ;;  %v1535_v14 = vsub.f32 0.0, %v1529_v3  ;;  %v1540_v15 = vmul.f32 1.442695, %v1532_v4  ;;  %v2856_v44 = vld [vmem:[%s2760_s27 + $0x28] sm:$0xff]  ;;  %v2859_v45 = vld [vmem:[%s2760_s27 + $0x38] sm:$0xff]  ;;  %s773_s30 = scalar_lea.vmem %s3410_s2, %s3521_s12 }
  0xac   : > { %v1542_v16 = vmul.f32 1.442695, %v1533_v7  ;;  %v805_v19 = vmax.f32 %v2810_v1, %v2815_v5  ;;  %v812_v22 = vmax.f32 %v2821_v10, %v2824_v11  ;;  %v1650_v24 = vadd.s32 1, %v1927_v17  ;;  %v2872_v17 = vld [vmem:[%s2760_s27 + $0x40] sm:$0xff] }
  0xad   : > { %2090 = vpow2.f32 %v1540_v15  ;;  %v1544_v20 = vmul.f32 1.442695, %v1534_v13  ;;  %v1546_v21 = vmul.f32 1.442695, %v1535_v14  ;;  %v1651_v25 = vadd.s32 1, %v1929_v18  ;;  %v2875_v18 = vld [vmem:[%s2760_s27 + $0x50] sm:$0xff] }
  0xae   : > { %2092 = vpow2.f32 %v1542_v16  ;;  %v1611_v28 = vrot.slane %v2805_v62, 5  ;;  %v1647_v30 = vadd.s32 16, %v2770_v42  ;;  %v1655_v32 = vrot.slane %v1650_v24, %v2800_v59 }
  0xaf   : > { %2094 = vpow2.f32 %v1544_v20  ;;  %v1659_v33 = vrot.slane %v1651_v25, %v2800_v59  ;;  %v2845_v34 = vmul.f32 %v1610_v12, %v2763_v38  ;;  %v806_v35 = vrot.slane %v805_v19, 4 }
  0xb0   : > { %2096 = vpow2.f32 %v1546_v21  ;;  %v813_v36 = vrot.slane %v812_v22, 4  ;;  %v819_v40 = vmax.f32 %v2833_v26, %v2836_v27  ;;  %vm1660_vm1 = vcmp.eq.s32.totalorder %v2770_v42, %v1655_v32 }
  0xb1   : > { %vm1661_vm2 = vcmp.eq.s32.totalorder %v2770_v42, %v1659_v33  ;;  %vm1662_vm3 = vcmp.eq.s32.totalorder %v2780_v48, %v1655_v32  ;;  %vm1663_vm4 = vcmp.eq.s32.totalorder %v2780_v48, %v1659_v33  ;;  %vm1664_vm5 = vcmp.eq.s32.totalorder %v1647_v30, %v1655_v32 }
  0xb2   : > { %vm1665_vm6 = vcmp.eq.s32.totalorder %v1647_v30, %v1659_v33  ;;  %v1666_v41 = vsel %vm1660_vm1, %v2763_v38, 0.0  ;;  %v1667_v43 = vsel %vm1661_vm2, %v2766_v39, 0.0  ;;  %v1668_v46 = vsel %vm1662_vm3, %v2777_v47, 0.0 }
  0xb3   : > { %v1669_v51 = vsel %vm1663_vm4, %v2783_v49, 0.0  ;;  %v1670_v52 = vsel %vm1664_vm5, %v2786_v50, 0.0  ;;  %v1671_v54 = vsel %vm1665_vm6, %v2789_v53, 0.0  ;;  %v1672_v0 = vadd.f32 %v1668_v46, %v1666_v41 }
  0xb4   : > { %v1673_v2 = vsel %vm1627_vm0, %v1670_v52, 0.0  ;;  %v1681_v3 = vadd.f32 %v1669_v51, %v1667_v43  ;;  %v1682_v4 = vsel %vm1627_vm0, %v1671_v54, 0.0  ;;  %v820_v12 = vrot.slane %v819_v40, 4 }
  0xb5   : > { %v2869_v13 = vmax.f32 %v2856_v44, %v2859_v45  ;;  %v1674_v16 = vadd.f32 %v1673_v2, %v1672_v0  ;;  %v807_v20 = vmax.f32 %v805_v19, %v806_v35  ;;  %v2878_v24 = vmul.f32 %v1611_v28, %v2766_v39 }
  0xb6   : > { %v1683_v25 = vadd.f32 %v1682_v4, %v1681_v3  ;;  %v814_v33 = vmax.f32 %v812_v22, %v813_v36  ;;  %v821_v46 = vmax.f32 %v819_v40, %v820_v12  ;;  %v833_v52 = vmax.f32 %v2872_v17, %v2875_v18 }
  0xb7   : > { %v2087_v60 = vpop.eup %2086  ;;  %v1675_v32 = vrot.slane %v1674_v16, 4  ;;  %v827_v51 = vrot.slane %v2869_v13, 4  ;;  %v808_v2 = vrot.slane %v807_v20, 2  ;;  %vm781_vm9 = vcmp.lt.s32.totalorder %v2794_v56, 288 }
  0xb8   : > { %v2089_v7 = vpop.eup %2088  ;;  %v1548_v8 = vadd.f32 1.0, %v2087_v60  ;;  %v1551_v9 = vmul.f32 -0.5, %v2087_v60  ;;  %v1554_v30 = vand.u32 2147483647, %v2087_v60  ;;  %v815_v6 = vrot.slane %v814_v33, 2 }
  0xb9   : > { %v1557_v14 = vadd.f32 1.0, %v2089_v7  ;;  %v1560_v15 = vmul.f32 -0.5, %v2089_v7  ;;  %v1563_v43 = vand.u32 2147483647, %v2089_v7  ;;  %v809_v37 = vmax.f32 %v807_v20, %v808_v2 }
  0xba   : > { %2098 = vlog2.f32 %v1548_v8  ;;  %v1552_v21 = vadd.f32 1.0, %v1551_v9  ;;  %v2091_v41 = vpop.eup %2090  ;;  %v1684_v9 = vrot.slane %v1683_v25, 4  ;;  %vm2885_vm7 = vcmp.lt.f32.partialorder %v1554_v30, 0.0004427343 }
  0xbb   : > { %2100 = vlog2.f32 %v1557_v14  ;;  %v2093_v54 = vpop.eup %2092  ;;  %v1561_v19 = vadd.f32 1.0, %v1560_v15  ;;  %v1566_v35 = vadd.f32 1.0, %v2091_v41  ;;  %v1569_v0 = vmul.f32 -0.5, %v2091_v41 }
  0xbc   : > { %v2095_v28 = vpop.eup %2094  ;;  %v2883_v8 = vmul.f32 %v2087_v60, %v1552_v21  ;;  %v1575_v3 = vadd.f32 1.0, %v2093_v54  ;;  %v1578_v4 = vmul.f32 -0.5, %v2093_v54  ;;  %v1676_v14 = vadd.f32 %v1675_v32, %v1674_v16 }
  0xbd   : > { %v2097_v22 = vpop.eup %2096  ;;  %2102 = vlog2.f32 %v1566_v35  ;;  %v1570_v40 = vadd.f32 1.0, %v1569_v0  ;;  %v1584_v12 = vadd.f32 1.0, %v2095_v28  ;;  %vm2889_vm8 = vcmp.lt.f32.partialorder %v1563_v43, 0.0004427343 }
  0xbe   : > { %v1572_v31 = vand.u32 2147483647, %v2091_v41  ;;  %2104 = vlog2.f32 %v1575_v3  ;;  %v1579_v60 = vadd.f32 1.0, %v1578_v4  ;;  %v1587_v21 = vmul.f32 -0.5, %v2095_v28 }
  0xbf   : > { %v1581_v29 = vand.u32 2147483647, %v2093_v54  ;;  %2106 = vlog2.f32 %v1584_v12  ;;  %v1593_v23 = vadd.f32 1.0, %v2097_v22  ;;  %v1562_v30 = vmul.f32 %v2089_v7, %v1561_v19 }
  0xc0   : > { %v1590_v63 = vand.u32 2147483647, %v2095_v28  ;;  %v1596_v58 = vmul.f32 -0.5, %v2097_v22  ;;  %v2893_v35 = vmul.f32 %v2091_v41, %v1570_v40  ;;  %v1677_v16 = vrot.slane %v1676_v14, 2  ;;  %v2908_v41 = vld [vmem:[%s2760_s27 + $0x48] sm:$0xff] }
  0xc1   : > { %2108 = vlog2.f32 %v1593_v23  ;;  %v1685_v32 = vadd.f32 %v1684_v9, %v1683_v25  ;;  %vm2896_vm10 = vcmp.lt.f32.partialorder %v1572_v31, 0.0004427343  ;;  %v2900_v0 = vmul.f32 %v2093_v54, %v1579_v60  ;;  %v2911_v31 = vld [vmem:[%s2760_s27 + $0x58] sm:$0xff] }
  0xc2   : > { %v1588_v3 = vadd.f32 1.0, %v1587_v21  ;;  %v1597_v7 = vadd.f32 1.0, %v1596_v58  ;;  %v1599_v19 = vand.u32 2147483647, %v2097_v22  ;;  %vm782_vm11 = vcmp.lt.s32.totalorder %v2803_v61, 288 }
  0xc3   : > { %vm2903_vm13 = vcmp.lt.f32.partialorder %v1581_v29, 0.0004427343  ;;  %v1678_v23 = vadd.f32 %v1677_v16, %v1676_v14  ;;  %v1686_v25 = vrot.slane %v1685_v32, 2  ;;  %v816_v2 = vmax.f32 %v814_v33, %v815_v6 }
  0xc4   : > { %v822_v4 = vrot.slane %v821_v46, 2  ;;  %vm2913_vm14 = vcmp.lt.f32.partialorder %v1590_v63, 0.0004427343  ;;  %v810_v58 = vrot.slane %v809_v37, 1  ;;  %v828_v9 = vmax.f32 %v2869_v13, %v827_v51 }
  0xc5   : > { %v834_v40 = vrot.slane %v833_v52, 4  ;;  %v1679_v12 = vrot.slane %v1678_v23, 1  ;;  %v2918_v60 = vadd.f32 %v1686_v25, %v1685_v32  ;;  %v817_v14 = vrot.slane %v816_v2, 1 }
  0xc6   : > { %v2920_v21 = vmax.f32 %v821_v46, %v822_v4  ;;  %v829_v6 = vrot.slane %v828_v9, 2  ;;  %v840_v33 = vmax.f32 %v2908_v41, %v2911_v31  ;;  %v1589_v42 = vmul.f32 %v2095_v28, %v1588_v3  ;;  %v2945_v3 = vld [vmem:[%s2760_s27 + $0x70] sm:$0xff] }
  0xc7   : > { %v2099_v29 = vpop.eup %2098  ;;  %v835_v63 = vmax.f32 %v833_v52, %v834_v40  ;;  %v1598_v13 = vmul.f32 %v2097_v22, %v1597_v7  ;;  %vm2924_vm15 = vcmp.lt.f32.partialorder %v1599_v19, 0.0004427343  ;;  %v2931_v32 = vmax.f32 %v809_v37, %v810_v58  ;;  %v2942_v22 = vld [vmem:[%s2760_s27 + $0x60] sm:$0xff] }
  0xc8   : > { %v2101_v16 = vpop.eup %2100  ;;  %v1550_v48 = vmul.f32 0.6931472, %v2099_v29  ;;  %v830_v25 = vmax.f32 %v828_v9, %v829_v6  ;;  %v3463_v40 = vmax.f32 %v2763_v38, 0.0  ;;  %v2939_v28 = vadd.f32 %v1679_v12, %v1678_v23 }
  0xc9   : > { %v1559_v59 = vmul.f32 0.6931472, %v2101_v16  ;;  %v836_v4 = vrot.slane %v835_v63, 2  ;;  %v841_v7 = vrot.slane %v840_v33, 4  ;;  %v3464_v37 = vmax.f32 %v2766_v39, 0.0 }
  0xca   : > { %v1556_v46 = vsel %vm2885_vm7, %v2883_v8, %v1550_v48  ;;  %v2103_v36 = vpop.eup %2102  ;;  %v1688_v8 = vrot.slane %v2918_v60, 1  ;;  %v2952_v15 = vmax.f32 %v816_v2, %v817_v14  ;;  %v824_v38 = vrot.slane %v2920_v21, 1 }
  0xcb   : > { %v1565_v52 = vsel %vm2889_vm8, %v1562_v30, %v1559_v59  ;;  %v2937_v29 = vadd.f32 %v1556_v46, %v3463_v40  ;;  %v2105_v59 = vpop.eup %2104  ;;  %v1568_v19 = vmul.f32 0.6931472, %v2103_v36  ;;  %v831_v23 = vrot.slane %v830_v25, 1 }
  0xcc   : > { %v2949_v48 = vadd.f32 %v1565_v52, %v3464_v37  ;;  %v842_v58 = vmax.f32 %v840_v33, %v841_v7  ;;  %v2107_v9 = vpop.eup %2106  ;;  %v1577_v39 = vmul.f32 0.6931472, %v2105_v59  ;;  %v837_v16 = vmax.f32 %v835_v63, %v836_v4  ;;  %v2980_v59 = vld [vmem:[%s2760_s27 + $0x68] sm:$0xff] }
  0xcd   : > { %v1616_v30 = vsub.f32 %v2937_v29, %v2845_v34  ;;  %v847_v2 = vmax.f32 %v2942_v22, %v2945_v3  ;;  %v1574_v34 = vsel %vm2896_vm10, %v2893_v35, %v1568_v19  ;;  %v1586_v6 = vmul.f32 0.6931472, %v2107_v9 }
  0xce   : > { %v1617_v12 = vsub.f32 %v2949_v48, %v2878_v24  ;;  %v843_v33 = vrot.slane %v842_v58, 2  ;;  %v2109_v46 = vpop.eup %2108  ;;  %v1583_v63 = vsel %vm2903_vm13, %v2900_v0, %v1577_v39  ;;  %v3465_v4 = vmax.f32 %v2777_v47, 0.0 }
  0xcf   : > { %v1618_v14 = vsel %vm781_vm9, %v1616_v30, 0.0  ;;  %v1592_v35 = vsel %vm2913_vm14, %v1589_v42, %v1586_v6  ;;  %v1595_v43 = vmul.f32 0.6931472, %v2109_v46  ;;  %v3466_v36 = vmax.f32 %v2783_v49, 0.0  ;;  %v2983_v30 = vld [vmem:[%s2760_s27 + $0x78] sm:$0xff] }
  0xd0   : > { %v1619_v24 = vsel %vm782_vm11, %v1617_v12, 0.0  ;;  %v1621_v52 = vsel %vm1620_vm12, %v1618_v14, 0.0  ;;  %v1604_v40 = vadd.f32 %v1574_v34, %v3465_v4  ;;  %v3467_v20 = vmax.f32 %v2786_v50, 0.0 }
  0xd1   : > { %v1622_v7 = vsel %vm1620_vm12, %v1619_v24, 0.0  ;;  %v1605_v37 = vadd.f32 %v1583_v63, %v3466_v36  ;;  %v838_v9 = vrot.slane %v837_v16, 1  ;;  %v1601_v12 = vsel %vm2924_vm15, %v1598_v13, %v1595_v43 }
  0xd2   : > { %v1623_v19 = vadd.f32 %v1622_v7, %v1621_v52  ;;  %v1606_v0 = vadd.f32 %v1592_v35, %v3467_v20  ;;  %v1626_v47 = vadd.f32 %v1604_v40, %v2937_v29  ;;  %v844_v54 = vmax.f32 %v842_v58, %v843_v33 }
  0xd3   : > { %v1636_v42 = vadd.f32 %v1605_v37, %v2949_v48  ;;  %v848_v39 = vrot.slane %v847_v2, 4  ;;  %v3468_v49 = vmax.f32 %v2789_v53, 0.0  ;;  %v2995_v6 = vadd.f32 %v1688_v8, %v2918_v60 }
  0xd4   : > { %1624 = vadd.xlane.f32.xlu0 %v1623_v19  ;;  %v1628_v34 = vsel %vm1627_vm0, %v1606_v0, 0.0  ;;  %v854_v50 = vmax.f32 %v2980_v59, %v2983_v30  ;;  %v825_v51 = vmax.f32 %v2920_v21, %v824_v38  ;;  %v845_v13 = vrot.slane %v844_v54, 1 }
  0xd5   : > { %v1607_v14 = vadd.f32 %v1601_v12, %v3468_v49  ;;  %v1629_v46 = vadd.f32 %v1628_v34, %v1626_v47  ;;  %v849_v24 = vmax.f32 %v847_v2, %v848_v39  ;;  %v832_v33 = vmax.f32 %v830_v25, %v831_v23 }
  0xd6   : > { %v3001_v52 = vmax.f32 %v837_v16, %v838_v9  ;;  %v855_v53 = vrot.slane %v854_v50, 4  ;;  %v861_v60 = vsub.f32 %v2810_v1, %v2931_v32  ;;  %v862_v7 = vsub.f32 %v2821_v10, %v2952_v15 }
  0xd7   : > { %v1637_v58 = vsel %vm1627_vm0, %v1607_v14, 0.0  ;;  %v1630_v63 = vrot.slane %v1629_v46, 4  ;;  %v850_v40 = vrot.slane %v849_v24, 2  ;;  %v863_v21 = vsub.f32 %v2815_v5, %v2931_v32 }
  0xd8   : > { %v1638_v4 = vadd.f32 %v1637_v58, %v1636_v42  ;;  %v856_v8 = vmax.f32 %v854_v50, %v855_v53  ;;  %v864_v38 = vsub.f32 %v2824_v11, %v2952_v15  ;;  %v846_v16 = vmax.f32 %v844_v54, %v845_v13 }
  0xd9   : > { %v1631_v25 = vadd.f32 %v1630_v63, %v1629_v46  ;;  %v851_v2 = vmax.f32 %v849_v24, %v850_v40  ;;  %v865_v43 = vsub.f32 %v2833_v26, %v825_v51  ;;  %v866_v36 = vsub.f32 %v2856_v44, %v832_v33 }
  0xda   : > { %v1639_v23 = vrot.slane %v1638_v4, 4  ;;  %v857_v35 = vrot.slane %v856_v8, 2  ;;  %v867_v1 = vsub.f32 %v2836_v27, %v825_v51  ;;  %vm785_vm0 = vcmp.gt.f32.partialorder %v2796_v57, 0.0 }
  0xdb   : > { %v1632_v10 = vrot.slane %v1631_v25, 2  ;;  %v852_v19 = vrot.slane %v851_v2, 1  ;;  %v868_v5 = vsub.f32 %v2859_v45, %v832_v33  ;;  %v869_v11 = vsub.f32 %v2872_v17, %v3001_v52  ;;  %vm3034_vm3 = vmand %vm785_vm0, %vm781_vm9 }
  0xdc   : > { %v1640_v37 = vadd.f32 %v1639_v23, %v1638_v4  ;;  %v858_v32 = vmax.f32 %v856_v8, %v857_v35  ;;  %v877_v15 = vmul.f32 1.442695, %v861_v60  ;;  %v879_v20 = vmul.f32 1.442695, %v862_v7 }
  0xdd   : > { %vm786_vm1 = vcmp.gt.f32.partialorder %v2805_v62, 0.0  ;;  %v1633_v26 = vadd.f32 %v1632_v10, %v1631_v25  ;;  %v870_v44 = vsub.f32 %v2908_v41, %v846_v16  ;;  %v881_v27 = vmul.f32 1.442695, %v863_v21 }
  0xde   : > { %v1641_v0 = vrot.slane %v1640_v37, 2  ;;  %v853_v47 = vmax.f32 %v851_v2, %v852_v19  ;;  %v859_v9 = vrot.slane %v858_v32, 1  ;;  %v871_v12 = vsub.f32 %v2875_v18, %v3001_v52  ;;  %vm3049_vm4 = vmand %vm786_vm1, %vm782_vm11 }
  0xdf   : > { %v883_v42 = vmul.f32 1.442695, %v864_v38  ;;  %vm3419_vm2 = vcmask 1045509   ;;  %v1634_v45 = vrot.slane %v1633_v26, 1  ;;  %2110 = vpow2.f32 %v877_v15 }
  0xe0   : > { %v1642_v54 = vadd.f32 %v1641_v0, %v1640_v37  ;;  %v885_v17 = vmul.f32 1.442695, %v865_v43  ;;  %v860_v39 = vmax.f32 %v858_v32, %v859_v9  ;;  %v872_v49 = vsub.f32 %v2911_v31, %v846_v16 }
  0xe1   : > { %2112 = vpow2.f32 %v879_v20  ;;  %v887_v14 = vmul.f32 1.442695, %v866_v36  ;;  %v1635_v34 = vadd.f32 %v1634_v45, %v1633_v26  ;;  %v889_v41 = vmul.f32 1.442695, %v867_v1 }
  0xe2   : > { %v1643_v50 = vrot.slane %v1642_v54, 1  ;;  %2114 = vpow2.f32 %v881_v27  ;;  %v873_v46 = vsub.f32 %v2942_v22, %v853_v47  ;;  %v875_v51 = vsub.f32 %v2945_v3, %v853_v47 }
  0xe3   : > { %2116 = vpow2.f32 %v883_v42  ;;  %v891_v18 = vmul.f32 1.442695, %v868_v5  ;;  %v1645_v24 = vsub.f32 %v1635_v34, %v2937_v29  ;;  %v893_v58 = vmul.f32 1.442695, %v869_v11 }
  0xe4   : > { %v1644_v13 = vadd.f32 %v1643_v50, %v1642_v54  ;;  %2118 = vpow2.f32 %v885_v17  ;;  %v874_v33 = vsub.f32 %v2980_v59, %v860_v39  ;;  %v876_v31 = vsub.f32 %v2983_v30, %v860_v39 }
  0xe5   : > { %2120 = vpow2.f32 %v887_v14  ;;  %v895_v52 = vmul.f32 1.442695, %v870_v44  ;;  %v1690_v63 = vsub.f32 %v1645_v24, %v2939_v28  ;;  %v897_v22 = vmul.f32 1.442695, %v871_v12  ;;  %v3479_v12 = vld [vmem:[#allocation4_spill] sm:$0xff] }
  0xe6   : > { %v1646_v53 = vsub.f32 %v1644_v13, %v2949_v48  ;;  %2122 = vpow2.f32 %v889_v41  ;;  %v3469_v29 = vmov 0  ;;  %v899_v3 = vmul.f32 1.442695, %v872_v49 }
  0xe7   : > { %v3470_v29 = vsel %vm3034_vm3, 4294967295, %v3469_v29  ;;  %2124 = vpow2.f32 %v891_v18  ;;  %v3039_v59 = vmul.f32 16.0, %v2796_v57  ;;  %v3042_v30 = vmul.f32 16.0, %v2805_v62 }
  0xe8   : > { %3471 = vst [vmem:[#allocation7_spill] sm:$0xff] %v3470_v29  ;;  %v1691_v28 = vsub.f32 %v1646_v53, %v2995_v6  ;;  %v1694_v48 = vrot.slane %v1690_v63, 3  ;;  %2126 = vpow2.f32 %v893_v58  ;;  %v901_v4 = vmul.f32 1.442695, %v873_v46 }
  0xe9   : > { %3472 = vst [vmem:[#allocation8_spill] sm:$0xff] %v3039_v59  ;;  %3473 = vst [vmem:[#allocation9_spill] sm:$0xff] %v3042_v30  ;;  %v3474_v56 = vmov 0  ;;  %2128 = vpow2.f32 %v895_v52  ;;  %v903_v40 = vmul.f32 1.442695, %v874_v33  ;;  %v3054_v60 = vfloor.f32 %v3039_v59 }
  0xea   : > { %v3475_v56 = vsel %vm3049_vm4, 4294967295, %v3474_v56  ;;  %v905_v57 = vmul.f32 1.442695, %v875_v51  ;;  %v1695_v8 = vrot.slane %v1691_v28, 3  ;;  %v1698_v6 = vsel %vm3034_vm3, %v1694_v48, 0.0 }
  0xeb   : > { %3476 = vst [vmem:[#allocation10_spill] sm:$0xff] %v3475_v56  ;;  %3477 = vst [vmem:[#allocation11_spill] sm:$0xff] %v3054_v60  ;;  %2130 = vpow2.f32 %v897_v22  ;;  %v3059_v7 = vfloor.f32 %v3042_v30  ;;  %v1700_v61 = vsel %vm3419_vm2, %v1698_v6, 0.0  ;;  %v907_v62 = vmul.f32 1.442695, %v876_v31 }
  0xec   : > { %2132 = vpow2.f32 %v899_v3  ;;  %v1699_v21 = vsel %vm3049_vm4, %v1695_v8, 0.0  ;;  %v989_v38 = vmax.f32 %v3054_v60, 0.0  ;;  %v3066_v23 = vpop.eup %2110  ;;  %v999_v2 = vunpack.c.0.s8 %v2791_v55 }
  0xed   : > { %3478 = vst [vmem:[#allocation12_spill] sm:$0xff] %v3059_v7  ;;  %2134 = vpow2.f32 %v901_v4  ;;  %v990_v25 = vmax.f32 %v3059_v7, 0.0  ;;  %v1701_v16 = vsel %vm3419_vm2, %v1699_v21, 0.0  ;;  %v1035_v37 = vadd.f32 1.0, %v3054_v60 }
  0xee   : > { %2136 = vpow2.f32 %v903_v40  ;;  %v3070_v35 = vpop.eup %2112  ;;  %v1702_v43 = vadd.f32 %v1701_v16, %v1700_v61  ;;  %v991_v36 = vmin.f32 %v989_v38, 15.0  ;;  %v1036_v19 = vadd.f32 1.0, %v3059_v7 }
  0xef   : > { %2138 = vpow2.f32 %v905_v57  ;;  %v992_v1 = vmin.f32 %v990_v25, 15.0  ;;  %v3072_v10 = vpop.eup %2114  ;;  %v1037_v26 = vmax.f32 %v1035_v37, 0.0  ;;  %v3087_v42 = vsub.s32 %v999_v2, %v3479_v12 }
  0xf0   : > { %2140 = vpow2.f32 %v907_v62  ;;  %v3076_v5 = vpop.eup %2116  ;;  %1703 = vadd.xlane.f32.xlu1 %v1702_v43  ;;  %v909_v32 = vadd.f32 %v3072_v10, %v3066_v23  ;;  %v1918_v55 = vtrunc.f32 %v991_v36  ;;  %v1038_v0 = vmax.f32 %v1036_v19, 0.0 }
  0xf1   : > { %v1920_v11 = vtrunc.f32 %v992_v1  ;;  %v3080_v15 = vpop.eup %2118  ;;  %v916_v20 = vadd.f32 %v3076_v5, %v3070_v35  ;;  %v1039_v17 = vmin.f32 %v1037_v26, 15.0  ;;  %v3106_v28 = vsub.s32 1, %v3479_v12 }
  0xf2   : > { %v3084_v44 = vpop.eup %2120  ;;  %v910_v27 = vrot.slane %v909_v32, 4  ;;  %v1919_v47 = vcvt.f32.s32 %v1918_v55  ;;  %v1040_v39 = vmin.f32 %v1038_v0, 15.0 }
  0xf3   : > { %v1921_v9 = vcvt.f32.s32 %v1920_v11  ;;  %v3089_v45 = vpop.eup %2122  ;;  %v917_v54 = vrot.slane %v916_v20, 4  ;;  %v1922_v13 = vtrunc.f32 %v1039_v17 }
  0xf4   : > { %v3091_v49 = vpop.eup %2124  ;;  %v911_v14 = vadd.f32 %v910_v27, %v909_v32  ;;  %v923_v34 = vadd.f32 %v3089_v45, %v3080_v15  ;;  %v1924_v24 = vtrunc.f32 %v1040_v39 }
  0xf5   : > { %v995_v50 = vcombine.low %v1919_v47, %v1921_v9  ;;  %v996_v41 = vcombine.high %v1919_v47, %v1921_v9  ;;  %v3095_v46 = vpop.eup %2126  ;;  %v918_v51 = vadd.f32 %v917_v54, %v916_v20  ;;  %v930_v18 = vadd.f32 %v3091_v49, %v3084_v44 }
  0xf6   : > { %v3099_v58 = vpop.eup %2128  ;;  %v912_v33 = vrot.slane %v911_v14, 2  ;;  %v924_v31 = vrot.slane %v923_v34, 4  ;;  %v1923_v8 = vcvt.f32.s32 %v1922_v13  ;;  %v1925_v38 = vcvt.f32.s32 %v1924_v24 }
  0xf7   : > { %v1003_v52 = vrot.slane %v995_v50, %v3087_v42  ;;  %v919_v63 = vrot.slane %v918_v51, 2  ;;  %v931_v22 = vrot.slane %v930_v18, 4  ;;  %v1010_v3 = vrot.slane %v996_v41, %v3087_v42 }
  0xf8   : > { %v3102_v53 = vpop.eup %2130  ;;  %v913_v4 = vadd.f32 %v912_v33, %v911_v14  ;;  %v925_v40 = vadd.f32 %v924_v31, %v923_v34 }
  0xf9   : > { %v3108_v48 = vpop.eup %2132  ;;  %v937_v57 = vadd.f32 %v3102_v53, %v3095_v46  ;;  %v920_v61 = vadd.f32 %v919_v63, %v918_v51  ;;  %v932_v62 = vadd.f32 %v931_v22, %v930_v18  ;;  %v1011_v36 = vcombine.high %v1003_v52, %v1003_v52 }
  0xfa   : > { %v3112_v6 = vpop.eup %2134  ;;  %v944_v21 = vadd.f32 %v3108_v48, %v3099_v58  ;;  %v914_v16 = vrot.slane %v913_v4, 1  ;;  %v926_v2 = vrot.slane %v925_v40, 2  ;;  %v1018_v55 = vrot.slane %v1003_v52, %v3087_v42 }
  0xfb   : > { %v3116_v25 = vpop.eup %2136  ;;  %v938_v43 = vrot.slane %v937_v57, 4  ;;  %v921_v37 = vrot.slane %v920_v61, 1  ;;  %v933_v19 = vrot.slane %v932_v62, 2  ;;  %v1025_v50 = vrot.slane %v1010_v3, %v3087_v42 }
  0xfc   : > { %v3118_v1 = vpop.eup %2138  ;;  %v945_v32 = vrot.slane %v944_v21, 4  ;;  %v915_v20 = vadd.f32 %v914_v16, %v913_v4  ;;  %v927_v26 = vadd.f32 %v926_v2, %v925_v40  ;;  %v1032_v13 = vrot.slane %v1011_v36, %v3087_v42 }
  0xfd   : > { %v3121_v11 = vpop.eup %2140  ;;  %v939_v0 = vadd.f32 %v938_v43, %v937_v57  ;;  %v951_v27 = vadd.f32 %v3118_v1, %v3112_v6  ;;  %v922_v47 = vadd.f32 %v921_v37, %v920_v61  ;;  %v934_v9 = vadd.f32 %v933_v19, %v932_v62 }
  0xfe   : > { %v946_v54 = vadd.f32 %v945_v32, %v944_v21  ;;  %v958_v17 = vadd.f32 %v3121_v11, %v3116_v25  ;;  %v928_v39 = vrot.slane %v927_v26, 1  ;;  %2142 = vrcp.f32 %v915_v20 }
  0xff   : > { %v940_v14 = vrot.slane %v939_v0, 2  ;;  %v952_v34 = vrot.slane %v951_v27, 4  ;;  %v935_v41 = vrot.slane %v934_v9, 1  ;;  %2144 = vrcp.f32 %v922_v47 }
 0x100   : > { %v947_v51 = vrot.slane %v946_v54, 2  ;;  %v959_v18 = vrot.slane %v958_v17, 4  ;;  %v929_v24 = vadd.f32 %v928_v39, %v927_v26  ;;  %v1033_v57 = vcombine.high %v1018_v55, %v1018_v55 }
 0x101   : > { %v941_v33 = vadd.f32 %v940_v14, %v939_v0  ;;  %v953_v31 = vadd.f32 %v952_v34, %v951_v27  ;;  %v936_v52 = vadd.f32 %v935_v41, %v934_v9  ;;  %v1043_v61 = vcombine.low %v1923_v8, %v1925_v38  ;;  %v3480_v27 = vld [vmem:[#allocation6_spill] sm:$0xff] }
 0x102   : > { %v948_v63 = vadd.f32 %v947_v51, %v946_v54  ;;  %v960_v22 = vadd.f32 %v959_v18, %v958_v17  ;;  %v1034_v3 = vcombine.high %v1032_v13, %v1032_v13  ;;  %v1044_v16 = vcombine.high %v1923_v8, %v1925_v38 }
 0x103   : > { %v942_v4 = vrot.slane %v941_v33, 1  ;;  %v954_v40 = vrot.slane %v953_v31, 2  ;;  %2146 = vrcp.f32 %v929_v24  ;;  %v1051_v36 = vrot.slane %v1043_v61, %v3087_v42  ;;  %v3481_v24 = vld [vmem:[#allocation5_spill] sm:$0xff] }
 0x104   : > { %v949_v62 = vrot.slane %v948_v63, 1  ;;  %v961_v21 = vrot.slane %v960_v22, 2  ;;  %2148 = vrcp.f32 %v936_v52  ;;  %v1058_v32 = vrot.slane %v1044_v16, %v3087_v42 }
 0x105   : > { %v943_v2 = vadd.f32 %v942_v4, %v941_v33  ;;  %v955_v43 = vadd.f32 %v954_v40, %v953_v31  ;;  %v1059_v26 = vcombine.high %v1051_v36, %v1051_v36  ;;  %v1066_v55 = vrot.slane %v1051_v36, %v3087_v42 }
 0x106   : > { %v950_v37 = vadd.f32 %v949_v62, %v948_v63  ;;  %v962_v19 = vadd.f32 %v961_v21, %v960_v22  ;;  %v1089_v47 = vrot.slane %v1032_v13, %v3480_v27  ;;  %v1093_v8 = vrot.slane %v1032_v13, %v3106_v28 }
 0x107   : > { %v956_v20 = vrot.slane %v955_v43, 1  ;;  %2150 = vrcp.f32 %v943_v2  ;;  %v3135_v9 = vrot.slane %v1058_v32, %v3087_v42  ;;  %v1097_v54 = vrot.slane %v1033_v57, %v3480_v27 }
 0x108   : > { %v963_v0 = vrot.slane %v962_v19, 1  ;;  %2152 = vrcp.f32 %v950_v37  ;;  %v1101_v17 = vrot.slane %v1033_v57, %v3106_v28  ;;  %v3140_v39 = vrot.slane %v1059_v26, %v3087_v42 }
 0x109   : > { %v957_v38 = vadd.f32 %v956_v20, %v955_v43  ;;  %v3142_v14 = vcombine.high %v1066_v55, %v1066_v55  ;;  %v1105_v34 = vrot.slane %v1034_v3, %v3480_v27  ;;  %v1109_v41 = vrot.slane %v1034_v3, %v3106_v28 }
 0x10a   : > { %v3146_v51 = vadd.f32 %v963_v0, %v962_v19  ;;  %v1113_v18 = vrot.slane %v1025_v50, %v3480_v27  ;;  %v1117_v13 = vrot.slane %v1025_v50, %v3106_v28  ;;  %vm1118_vm5 = vcmp.eq.s32.totalorder %v3479_v12, %v1089_v47 }
 0x10b   : > { %2154 = vrcp.f32 %v957_v38  ;;  %vm1119_vm6 = vcmp.eq.s32.totalorder %v3479_v12, %v1093_v8  ;;  %vm1120_vm7 = vcmp.eq.s32.totalorder %v3481_v24, %v1089_v47  ;;  %vm1121_vm8 = vcmp.eq.s32.totalorder %v3481_v24, %v1093_v8  ;;  %v3158_v42 = vpop.eup %2142 }
 0x10c   : > { %vm1122_vm9 = vcmp.eq.s32.totalorder %v3479_v12, %v1097_v54  ;;  %vm1123_vm10 = vcmp.eq.s32.totalorder %v3479_v12, %v1101_v17  ;;  %vm1126_vm13 = vcmp.eq.s32.totalorder %v3479_v12, %v1105_v34  ;;  %vm1127_vm14 = vcmp.eq.s32.totalorder %v3479_v12, %v1109_v41  ;;  %v3164_v50 = vpop.eup %2144 }
 0x10d   : > { %vm1128_vm15 = vcmp.eq.s32.totalorder %v3481_v24, %v1105_v34  ;;  %vm1129_vm0 = vcmp.eq.s32.totalorder %v3481_v24, %v1109_v41  ;;  %vm1130_vm1 = vcmp.eq.s32.totalorder %v3479_v12, %v1113_v18  ;;  %vm1131_vm2 = vcmp.eq.s32.totalorder %v3479_v12, %v1117_v13 }
 0x10e   : > { %vm1132_vm11 = vcmp.eq.s32.totalorder %v3481_v24, %v1113_v18  ;;  %vm1133_vm12 = vcmp.eq.s32.totalorder %v3481_v24, %v1117_v13  ;;  %v1134_v33 = vsel %vm1118_vm5, %v3066_v23, 0.0  ;;  %v1135_v31 = vsel %vm1119_vm6, %v3070_v35, 0.0 }
 0x10f   : > { %v1136_v52 = vsel %vm1120_vm7, %v3072_v10, 0.0  ;;  %v1137_v63 = vsel %vm1121_vm8, %v3076_v5, 0.0  ;;  %v1138_v22 = vsel %vm1122_vm9, %v3080_v15, 0.0  ;;  %v1139_v4 = vsel %vm1123_vm10, %v3084_v44, 0.0 }
 0x110   : > { %vm3482_vm5 = vcmp.eq.s32.totalorder %v3481_v24, %v1097_v54  ;;  %vm3483_vm6 = vcmp.eq.s32.totalorder %v3481_v24, %v1101_v17  ;;  %v3194_v61 = vpop.eup %2146  ;;  %v1142_v62 = vsel %vm1126_vm13, %v3095_v46, 0.0  ;;  %v1143_v21 = vsel %vm1127_vm14, %v3099_v58, 0.0 }
 0x111   : > { %v1140_v40 = vsel %vm3482_vm5, %v3089_v45, 0.0  ;;  %v1141_v57 = vsel %vm3483_vm6, %v3091_v49, 0.0  ;;  %v1144_v3 = vsel %vm1128_vm15, %v3102_v53, 0.0  ;;  %v1145_v16 = vsel %vm1129_vm0, %v3108_v48, 0.0  ;;  %v3208_v2 = vpop.eup %2148 }
 0x112   : > { %v1146_v43 = vsel %vm1130_vm1, %v3112_v6, 0.0  ;;  %v1147_v36 = vsel %vm1131_vm2, %v3116_v25, 0.0  ;;  %v1148_v37 = vsel %vm1132_vm11, %v3118_v1, 0.0  ;;  %v1149_v19 = vsel %vm1133_vm12, %v3121_v11, 0.0 }
 0x113   : > { %v1150_v20 = vadd.f32 %v1136_v52, %v1134_v33  ;;  %v1157_v26 = vadd.f32 %v1137_v63, %v1135_v31  ;;  %v1164_v55 = vadd.f32 %v1140_v40, %v1138_v22  ;;  %v1171_v0 = vadd.f32 %v1141_v57, %v1139_v4 }
 0x114   : > { %v3222_v32 = vpop.eup %2150  ;;  %v1178_v8 = vadd.f32 %v1144_v3, %v1142_v62  ;;  %v1185_v38 = vadd.f32 %v1145_v16, %v1143_v21  ;;  %v1192_v54 = vadd.f32 %v1148_v37, %v1146_v43  ;;  %v1199_v17 = vadd.f32 %v1149_v19, %v1147_v36 }
 0x115   : > { %3484 = vst [vmem:[#allocation4_spill] sm:$0xff] %v3222_v32  ;;  %v3224_v47 = vpop.eup %2152  ;;  %v1151_v34 = vrot.slane %v1150_v20, 4  ;;  %v1158_v41 = vrot.slane %v1157_v26, 4  ;;  %v1165_v18 = vrot.slane %v1164_v55, 4  ;;  %v1172_v56 = vrot.slane %v1171_v0, 4 }
 0x116   : > { %3485 = vst [vmem:[#allocation6_spill] sm:$0xff] %v3224_v47  ;;  %v1179_v29 = vrot.slane %v1178_v8, 4  ;;  %v1186_v30 = vrot.slane %v1185_v38, 4  ;;  %v1193_v13 = vrot.slane %v1192_v54, 4  ;;  %v1200_v7 = vrot.slane %v1199_v17, 4 }
 0x117   : > { %v1152_v33 = vadd.f32 %v1151_v34, %v1150_v20  ;;  %v1159_v31 = vadd.f32 %v1158_v41, %v1157_v26  ;;  %v1166_v52 = vadd.f32 %v1165_v18, %v1164_v55  ;;  %v1173_v63 = vadd.f32 %v1172_v56, %v1171_v0 }
 0x118   : > { %v3226_v59 = vpop.eup %2154  ;;  %v1180_v22 = vadd.f32 %v1179_v29, %v1178_v8  ;;  %v1187_v4 = vadd.f32 %v1186_v30, %v1185_v38  ;;  %v1194_v40 = vadd.f32 %v1193_v13, %v1192_v54  ;;  %v1201_v57 = vadd.f32 %v1200_v7, %v1199_v17 }
 0x119   : > { %3486 = vst [vmem:[#allocation5_spill] sm:$0xff] %v3226_v59  ;;  %v1153_v62 = vrot.slane %v1152_v33, 2  ;;  %v1160_v21 = vrot.slane %v1159_v31, 2  ;;  %v1167_v3 = vrot.slane %v1166_v52, 2  ;;  %v1174_v16 = vrot.slane %v1173_v63, 2 }
 0x11a   : > { %v1181_v43 = vrot.slane %v1180_v22, 2  ;;  %v1188_v36 = vrot.slane %v1187_v4, 2  ;;  %v1195_v37 = vrot.slane %v1194_v40, 2  ;;  %v1202_v19 = vrot.slane %v1201_v57, 2 }
 0x11b   : > { %v1154_v60 = vadd.f32 %v1153_v62, %v1152_v33  ;;  %v1161_v47 = vadd.f32 %v1160_v21, %v1159_v31  ;;  %v1168_v32 = vadd.f32 %v1167_v3, %v1166_v52  ;;  %v1175_v59 = vadd.f32 %v1174_v16, %v1173_v63 }
 0x11c   : > { %v1182_v20 = vadd.f32 %v1181_v43, %v1180_v22  ;;  %v1189_v26 = vadd.f32 %v1188_v36, %v1187_v4  ;;  %v3228_v55 = vadd.f32 %v1195_v37, %v1194_v40  ;;  %v3230_v29 = vadd.f32 %v1202_v19, %v1201_v57 }
 0x11d   : > { %v1155_v30 = vrot.slane %v1154_v60, 1  ;;  %v1162_v56 = vrot.slane %v1161_v47, 1  ;;  %v1169_v7 = vrot.slane %v1168_v32, 1  ;;  %v1176_v0 = vrot.slane %v1175_v59, 1 }
 0x11e   : > { %2156 = vrcp.f32 %v3146_v51  ;;  %v1082_v8 = vcombine.high %v3140_v39, %v3140_v39  ;;  %v1183_v38 = vrot.slane %v1182_v20, 1  ;;  %v1190_v54 = vrot.slane %v1189_v26, 1 }
 0x11f   : > { %v3235_v17 = vadd.f32 %v1155_v30, %v1154_v60  ;;  %v3237_v34 = vadd.f32 %v1162_v56, %v1161_v47  ;;  %v1197_v41 = vrot.slane %v3228_v55, 1  ;;  %v1204_v18 = vrot.slane %v3230_v29, 1 }
 0x120   : > { %v3241_v13 = vadd.f32 %v1169_v7, %v1168_v32  ;;  %v3243_v33 = vadd.f32 %v1176_v0, %v1175_v59  ;;  %v3245_v31 = vadd.f32 %v1183_v38, %v1182_v20  ;;  %v3247_v51 = vadd.f32 %v1190_v54, %v1189_v26 }
 0x121   : > { %v1209_v52 = vrot.slane %v3140_v39, %v3480_v27  ;;  %v1213_v60 = vrot.slane %v3140_v39, %v3106_v28  ;;  %v1217_v47 = vrot.slane %v3142_v14, %v3480_v27  ;;  %v1221_v63 = vrot.slane %v3142_v14, %v3106_v28 }
 0x122   : > { %v1225_v32 = vrot.slane %v1082_v8, %v3480_v27  ;;  %v1229_v59 = vrot.slane %v1082_v8, %v3106_v28  ;;  %v1233_v22 = vrot.slane %v3135_v9, %v3480_v27  ;;  %v1237_v4 = vrot.slane %v3135_v9, %v3106_v28 }
 0x123   : > { %vm1238_vm2 = vcmp.eq.s32.totalorder %v3479_v12, %v1209_v52  ;;  %vm1239_vm7 = vcmp.eq.s32.totalorder %v3479_v12, %v1213_v60  ;;  %vm1240_vm8 = vcmp.eq.s32.totalorder %v3481_v24, %v1209_v52  ;;  %vm1241_vm9 = vcmp.eq.s32.totalorder %v3481_v24, %v1213_v60 }
 0x124   : > { %vm1244_vm12 = vcmp.eq.s32.totalorder %v3481_v24, %v1217_v47  ;;  %vm1245_vm13 = vcmp.eq.s32.totalorder %v3481_v24, %v1221_v63  ;;  %vm1246_vm14 = vcmp.eq.s32.totalorder %v3479_v12, %v1225_v32  ;;  %vm1247_vm15 = vcmp.eq.s32.totalorder %v3479_v12, %v1229_v59 }
 0x125   : > { %vm1248_vm0 = vcmp.eq.s32.totalorder %v3481_v24, %v1225_v32  ;;  %vm1249_vm1 = vcmp.eq.s32.totalorder %v3481_v24, %v1229_v59  ;;  %vm1250_vm5 = vcmp.eq.s32.totalorder %v3479_v12, %v1233_v22  ;;  %vm1251_vm6 = vcmp.eq.s32.totalorder %v3479_v12, %v1237_v4 }
 0x126   : > { %v1254_v28 = vsel %vm1238_vm2, %v3066_v23, 0.0  ;;  %v1255_v27 = vsel %vm1239_vm7, %v3070_v35, 0.0  ;;  %v1256_v9 = vsel %vm1240_vm8, %v3072_v10, 0.0  ;;  %v1257_v39 = vsel %vm1241_vm9, %v3076_v5, 0.0 }
 0x127   : > { %vm3487_vm10 = vcmp.eq.s32.totalorder %v3479_v12, %v1217_v47  ;;  %vm3488_vm11 = vcmp.eq.s32.totalorder %v3479_v12, %v1221_v63  ;;  %v1260_v35 = vsel %vm1244_vm12, %v3089_v45, 0.0  ;;  %v1261_v10 = vsel %vm1245_vm13, %v3091_v49, 0.0 }
 0x128   : > { %v1258_v14 = vsel %vm3487_vm10, %v3080_v15, 0.0  ;;  %v1259_v23 = vsel %vm3488_vm11, %v3084_v44, 0.0  ;;  %v1262_v5 = vsel %vm1246_vm14, %v3095_v46, 0.0  ;;  %v1263_v15 = vsel %vm1247_vm15, %v3099_v58, 0.0 }
 0x129   : > { %v1264_v44 = vsel %vm1248_vm0, %v3102_v53, 0.0  ;;  %v1265_v45 = vsel %vm1249_vm1, %v3108_v48, 0.0  ;;  %v1266_v49 = vsel %vm1250_vm5, %v3112_v6, 0.0  ;;  %v1267_v46 = vsel %vm1251_vm6, %v3116_v25, 0.0 }
 0x12a   : > { %vm3489_vm2 = vcmp.eq.s32.totalorder %v3481_v24, %v1233_v22  ;;  %vm3490_vm7 = vcmp.eq.s32.totalorder %v3481_v24, %v1237_v4  ;;  %v1270_v57 = vadd.f32 %v1256_v9, %v1254_v28  ;;  %v1277_v48 = vadd.f32 %v1257_v39, %v1255_v27 }
 0x12b   : > { %v1268_v58 = vsel %vm3489_vm2, %v3118_v1, 0.0  ;;  %v1269_v53 = vsel %vm3490_vm7, %v3121_v11, 0.0  ;;  %v3327_v40 = vpop.eup %2156  ;;  %v1284_v62 = vadd.f32 %v1260_v35, %v1258_v14  ;;  %v1291_v21 = vadd.f32 %v1261_v10, %v1259_v23 }
 0x12c   : > { %v1298_v3 = vadd.f32 %v1264_v44, %v1262_v5  ;;  %v1305_v6 = vadd.f32 %v1265_v45, %v1263_v15  ;;  %v1312_v16 = vadd.f32 %v1268_v58, %v1266_v49  ;;  %v1319_v43 = vadd.f32 %v1269_v53, %v1267_v46 }
 0x12d   : > { %v1271_v12 = vrot.slane %v1270_v57, 4  ;;  %v1278_v25 = vrot.slane %v1277_v48, 4  ;;  %v1285_v36 = vrot.slane %v1284_v62, 4  ;;  %v1292_v37 = vrot.slane %v1291_v21, 4 }
 0x12e   : > { %v1299_v19 = vrot.slane %v1298_v3, 4  ;;  %v1306_v1 = vrot.slane %v1305_v6, 4  ;;  %v1313_v20 = vrot.slane %v1312_v16, 4  ;;  %v1320_v26 = vrot.slane %v1319_v43, 4 }
 0x12f   : > { %v1272_v24 = vadd.f32 %v1271_v12, %v1270_v57  ;;  %v1279_v11 = vadd.f32 %v1278_v25, %v1277_v48  ;;  %v1286_v30 = vadd.f32 %v1285_v36, %v1284_v62  ;;  %v1293_v56 = vadd.f32 %v1292_v37, %v1291_v21  ;;  %v3492_v25 = vld [vmem:[#allocation6_spill] sm:$0xff]  ;;  %v3493_v37 = vld [vmem:[#allocation5_spill] sm:$0xff] }
 0x130   : > { %v1300_v7 = vadd.f32 %v1299_v19, %v1298_v3  ;;  %v1307_v0 = vadd.f32 %v1306_v1, %v1305_v6  ;;  %v1314_v8 = vadd.f32 %v1313_v20, %v1312_v16  ;;  %v1321_v38 = vadd.f32 %v1320_v26, %v1319_v43 }
 0x131   : > { %v1273_v54 = vrot.slane %v1272_v24, 2  ;;  %v1280_v52 = vrot.slane %v1279_v11, 2  ;;  %v1287_v60 = vrot.slane %v1286_v30, 2  ;;  %v1294_v47 = vrot.slane %v1293_v56, 2 }
 0x132   : > { %v1301_v63 = vrot.slane %v1300_v7, 2  ;;  %v1308_v32 = vrot.slane %v1307_v0, 2  ;;  %v1315_v59 = vrot.slane %v1314_v8, 2  ;;  %v1322_v22 = vrot.slane %v1321_v38, 2 }
 0x133   : > { %v1274_v4 = vadd.f32 %v1273_v54, %v1272_v24  ;;  %v1281_v28 = vadd.f32 %v1280_v52, %v1279_v11  ;;  %v1288_v27 = vadd.f32 %v1287_v60, %v1286_v30  ;;  %v1295_v9 = vadd.f32 %v1294_v47, %v1293_v56  ;;  %v3494_v54 = vld [vmem:[#allocation11_spill] sm:$0xff]  ;;  %v3495_v52 = vld [vmem:[#allocation8_spill] sm:$0xff] }
 0x134   : > { %v1302_v39 = vadd.f32 %v1301_v63, %v1300_v7  ;;  %v1309_v14 = vadd.f32 %v1308_v32, %v1307_v0  ;;  %v1316_v23 = vadd.f32 %v1315_v59, %v1314_v8  ;;  %v1323_v35 = vadd.f32 %v1322_v22, %v1321_v38  ;;  %v3497_v63 = vld [vmem:[#allocation9_spill] sm:$0xff] }
 0x135   : > { %v1275_v10 = vrot.slane %v1274_v4, 1  ;;  %v1282_v5 = vrot.slane %v1281_v28, 1  ;;  %v1289_v15 = vrot.slane %v1288_v27, 1  ;;  %v1296_v44 = vrot.slane %v1295_v9, 1 }
 0x136   : > { %v1198_v45 = vadd.f32 %v1197_v41, %v3228_v55  ;;  %v1205_v49 = vadd.f32 %v1204_v18, %v3230_v29  ;;  %v1303_v46 = vrot.slane %v1302_v39, 1  ;;  %v1310_v58 = vrot.slane %v1309_v14, 1  ;;  %v3491_v18 = vld [vmem:[#allocation4_spill] sm:$0xff] }
 0x137   : > { %v1276_v53 = vadd.f32 %v1275_v10, %v1274_v4  ;;  %v1283_v57 = vadd.f32 %v1282_v5, %v1281_v28  ;;  %v1317_v48 = vrot.slane %v1316_v23, 1  ;;  %v1324_v62 = vrot.slane %v1323_v35, 1 }
 0x138   : > { %v1290_v21 = vadd.f32 %v1289_v15, %v1288_v27  ;;  %v1297_v3 = vadd.f32 %v1296_v44, %v1295_v9  ;;  %v1304_v6 = vadd.f32 %v1303_v46, %v1302_v39  ;;  %v1311_v16 = vadd.f32 %v1310_v58, %v1309_v14 }
 0x139   : > { %v1326_v43 = vmul.f32 %v3158_v42, %v3235_v17  ;;  %v1327_v55 = vmul.f32 %v3164_v50, %v3237_v34  ;;  %v1328_v41 = vmul.f32 %v3194_v61, %v3241_v13  ;;  %v1329_v29 = vmul.f32 %v3208_v2, %v3243_v33 }
 0x13a   : > { %v1330_v12 = vmul.f32 %v3491_v18, %v3245_v31  ;;  %v1331_v36 = vmul.f32 %v3492_v25, %v3247_v51  ;;  %v1332_v19 = vmul.f32 %v3493_v37, %v1198_v45  ;;  %v1333_v1 = vmul.f32 %v3327_v40, %v1205_v49 }
 0x13b   : > { %v1334_v17 = vadd.f32 1e-06, %v1326_v43  ;;  %v1335_v20 = vadd.f32 1e-06, %v1327_v55  ;;  %v1336_v26 = vadd.f32 1e-06, %v1328_v41  ;;  %v1384_v34 = vmul.f32 %v3158_v42, %v1276_v53 }
 0x13c   : > { %v1318_v24 = vadd.f32 %v1317_v48, %v1316_v23  ;;  %v1325_v13 = vadd.f32 %v1324_v62, %v1323_v35  ;;  %v1337_v11 = vadd.f32 1e-06, %v1329_v29  ;;  %v1385_v33 = vmul.f32 %v3164_v50, %v1283_v57 }
 0x13d   : > { %v1338_v30 = vadd.f32 1e-06, %v1330_v12  ;;  %2158 = vlog2.f32 %v1334_v17  ;;  %v1339_v31 = vadd.f32 1e-06, %v1331_v36  ;;  %v1340_v56 = vadd.f32 1e-06, %v1332_v19 }
 0x13e   : > { %2160 = vlog2.f32 %v1335_v20  ;;  %v1386_v51 = vmul.f32 %v3194_v61, %v1290_v21  ;;  %v1387_v7 = vmul.f32 %v3208_v2, %v1297_v3  ;;  %v1388_v0 = vmul.f32 %v3491_v18, %v1304_v6  ;;  %v3496_v61 = vld [vmem:[#allocation12_spill] sm:$0xff] }
 0x13f   : > { %2162 = vlog2.f32 %v1336_v26  ;;  %v1389_v8 = vmul.f32 %v3492_v25, %v1311_v16  ;;  %v1341_v42 = vadd.f32 1e-06, %v1333_v1  ;;  %v1390_v38 = vmul.f32 %v3493_v37, %v1318_v24 }
 0x140   : > { %2164 = vlog2.f32 %v1337_v11  ;;  %v1391_v50 = vmul.f32 %v3327_v40, %v1325_v13  ;;  %v3359_v60 = vsub.f32 %v3495_v52, %v3494_v54  ;;  %v1392_v47 = vadd.f32 1e-06, %v1384_v34 }
 0x141   : > { %2166 = vlog2.f32 %v1338_v30  ;;  %v3363_v32 = vsub.f32 %v3497_v63, %v3496_v61  ;;  %v1393_v2 = vadd.f32 1e-06, %v1385_v33  ;;  %v1394_v59 = vadd.f32 1e-06, %v1386_v51 }
 0x142   : > { %2168 = vlog2.f32 %v1339_v31  ;;  %v1395_v22 = vadd.f32 1e-06, %v1387_v7  ;;  %v987_v4 = vsub.f32 1.0, %v3359_v60  ;;  %v1396_v28 = vadd.f32 1e-06, %v1388_v0 }
 0x143   : > { %2170 = vlog2.f32 %v1340_v56  ;;  %v988_v40 = vsub.f32 1.0, %v3363_v32  ;;  %v1397_v27 = vadd.f32 1e-06, %v1389_v8  ;;  %v1398_v9 = vadd.f32 1e-06, %v1390_v38 }
 0x144   : > { %2172 = vlog2.f32 %v1341_v42  ;;  %v2345_v39 = vmov 0.0   ;;  %v1399_v5 = vadd.f32 1e-06, %v1391_v50  ;;  %vm3500_vm8 = vcmask 1045509  }
 0x145   : > { %2174 = vlog2.f32 %v1392_v47  ;;  %v1705_v23 = vsel %vm3034_vm3, 1.0, %v2345_v39  ;;  %v1706_v10 = vsel %vm3049_vm4, 1.0, %v2345_v39  ;;  %vm3501_vm9 = vmmov %vm3500_vm8  ;;  %v1360_v45 = vrot.slane %v987_v4, 1 }
 0x146   : > { %2176 = vlog2.f32 %v1393_v2  ;;  %v1707_v15 = vsel %vm3500_vm8, %v1705_v23, 0.0  ;;  %v1708_v44 = vsel %vm3501_vm9, %v1706_v10, 0.0  ;;  %v1361_v58 = vrot.slane %v988_v40, 1  ;;  %vm3502_vm14 = vmmov %vm3500_vm8 }
 0x147   : > { %2178 = vlog2.f32 %v1394_v59  ;;  %v1709_v49 = vadd.f32 %v1708_v44, %v1707_v15  ;;  %v1362_v48 = vrot.slane %v987_v4, 2  ;;  %v1363_v3 = vrot.slane %v988_v40, 2  ;;  %vm3503_vm15 = vmmov %vm3500_vm8 }
 0x148   : > { %2180 = vlog2.f32 %v1395_v22  ;;  %v1364_v43 = vrot.slane %v987_v4, 3  ;;  %v1365_v18 = vrot.slane %v988_v40, 3  ;;  %v1366_v37 = vrot.slane %v987_v4, 4 }
 0x149   : > { %2182 = vlog2.f32 %v1396_v28  ;;  %1710 = vadd.xlane.f32.xlu1 %v1709_v49  ;;  %v1367_v20 = vrot.slane %v988_v40, 4  ;;  %v1418_v11 = vrot.slane %v3359_v60, 1  ;;  %v1419_v56 = vrot.slane %v3363_v32, 1 }
 0x14a   : > { %v2159_v46 = vpop.eup %2158  ;;  %2184 = vlog2.f32 %v1397_v27  ;;  %v1420_v8 = vrot.slane %v3359_v60, 2  ;;  %v1421_v54 = vrot.slane %v3363_v32, 2  ;;  %v1422_v61 = vrot.slane %v3359_v60, 3 }
 0x14b   : > { %v2161_v53 = vpop.eup %2160  ;;  %v1343_v57 = vmul.f32 0.6931472, %v2159_v46  ;;  %2186 = vlog2.f32 %v1398_v9  ;;  %v1423_v22 = vrot.slane %v3363_v32, 3  ;;  %v1424_v27 = vrot.slane %v3359_v60, 4 }
 0x14c   : > { %v2163_v62 = vpop.eup %2162  ;;  %v1345_v21 = vmul.f32 0.6931472, %v2161_v53  ;;  %2188 = vlog2.f32 %v1399_v5  ;;  %v1425_v5 = vrot.slane %v3363_v32, 4  ;;  %vm1467_vm10 = vcmask 1041409  }
 0x14d   : > { %v2165_v6 = vpop.eup %2164  ;;  %v1347_v16 = vmul.f32 0.6931472, %v2163_v62  ;;  %v1376_v55 = vmul.f32 %v1360_v45, %v1343_v57  ;;  %vm1470_vm11 = vcmask 1042434   ;;  %vm1473_vm12 = vcmask 1043459  }
 0x14e   : > { %v2167_v41 = vpop.eup %2166  ;;  %v1349_v29 = vmul.f32 0.6931472, %v2165_v6  ;;  %v1377_v12 = vmul.f32 %v1361_v58, %v1345_v21  ;;  %vm1483_vm13 = vcmask 1043456  }
 0x14f   : > { %v2169_v25 = vpop.eup %2168  ;;  %v1351_v36 = vmul.f32 0.6931472, %v2167_v41  ;;  %v1378_v19 = vmul.f32 %v1362_v48, %v1347_v16 }
 0x150   : > { %v2171_v1 = vpop.eup %2170  ;;  %v1353_v17 = vmul.f32 0.6931472, %v2169_v25  ;;  %v1379_v26 = vmul.f32 %v1363_v3, %v1349_v29 }
 0x151   : > { %v2173_v34 = vpop.eup %2172  ;;  %v1355_v24 = vmul.f32 0.6931472, %v2171_v1  ;;  %v1380_v13 = vmul.f32 %v1364_v43, %v1351_v36 }
 0x152   : > { %v2175_v33 = vpop.eup %2174  ;;  %v1357_v30 = vmul.f32 0.6931472, %v2173_v34  ;;  %v1381_v31 = vmul.f32 %v1365_v18, %v1353_v17 }
 0x153   : > { %v2177_v51 = vpop.eup %2176  ;;  %v1382_v7 = vmul.f32 %v1366_v37, %v1355_v24  ;;  %v1401_v0 = vmul.f32 0.6931472, %v2175_v33 }
 0x154   : > { %v2179_v42 = vpop.eup %2178  ;;  %v1383_v38 = vmul.f32 %v1367_v20, %v1357_v30  ;;  %v1403_v50 = vmul.f32 0.6931472, %v2177_v51 }
 0x155   : > { %v2181_v52 = vpop.eup %2180  ;;  %v1405_v47 = vmul.f32 0.6931472, %v2179_v42  ;;  %v1434_v63 = vmul.f32 %v1418_v11, %v1401_v0 }
 0x156   : > { %v2183_v2 = vpop.eup %2182  ;;  %v1407_v59 = vmul.f32 0.6931472, %v2181_v52  ;;  %v1435_v4 = vmul.f32 %v1419_v56, %v1403_v50 }
 0x157   : > { %v2185_v28 = vpop.eup %2184  ;;  %v1409_v40 = vmul.f32 0.6931472, %v2183_v2  ;;  %v1436_v9 = vmul.f32 %v1420_v8, %v1405_v47  ;;  %v1442_v39 = vadd.f32 %v1434_v63, %v1376_v55 }
 0x158   : > { %v2187_v23 = vpop.eup %2186  ;;  %v1411_v10 = vmul.f32 0.6931472, %v2185_v28  ;;  %v1437_v15 = vmul.f32 %v1421_v54, %v1407_v59  ;;  %v1443_v44 = vadd.f32 %v1435_v4, %v1377_v12 }
 0x159   : > { %v2189_v45 = vpop.eup %2188  ;;  %v1413_v49 = vmul.f32 0.6931472, %v2187_v23  ;;  %v1438_v46 = vmul.f32 %v1422_v61, %v1409_v40  ;;  %v1444_v58 = vadd.f32 %v1436_v9, %v1378_v19  ;;  %v1450_v3 = vsub.f32 0.0, %v1442_v39  ;;  %v3504_v39 = vld [vmem:[#allocation3_spill] sm:$0xff] }
 0x15a   : > { %v1415_v53 = vmul.f32 0.6931472, %v2189_v45  ;;  %v1439_v57 = vmul.f32 %v1423_v22, %v1411_v10  ;;  %v1445_v48 = vadd.f32 %v1437_v15, %v1379_v26  ;;  %v1451_v43 = vsub.f32 0.0, %v1443_v44 }
 0x15b   : > { %v1440_v62 = vmul.f32 %v1424_v27, %v1413_v49  ;;  %v1446_v21 = vadd.f32 %v1438_v46, %v1380_v13  ;;  %v1452_v60 = vsub.f32 0.0, %v1444_v58  ;;  %vm1714_vm0 = vcmp.eq.s32.totalorder %v3504_v39, 1 }
 0x15c   : > { %v1441_v6 = vmul.f32 %v1425_v5, %v1415_v53  ;;  %v1447_v16 = vadd.f32 %v1439_v57, %v1381_v31  ;;  %v1453_v55 = vsub.f32 0.0, %v1445_v48  ;;  %vm1712_vm1 = vcmp.eq.s32.totalorder %v3504_v39, 0 }
 0x15d   : > { %v1448_v41 = vadd.f32 %v1440_v62, %v1382_v7  ;;  %v1454_v32 = vsub.f32 0.0, %v1446_v21  ;;  %v1466_v29 = vrot.slane %v1452_v60, 7  ;;  %v1625_v27 = vpop.xlane.xlu0 %1624 }
 0x15e   : > { %v1449_v18 = vadd.f32 %v1441_v6, %v1383_v38  ;;  %v1455_v12 = vsub.f32 0.0, %v1447_v16  ;;  %v1475_v25 = vrot.slane %v1453_v55, 7  ;;  %v1715_v23 = vsel %vm1714_vm0, %v1625_v27, 0.0 }
 0x15f   : > { %v1456_v36 = vsub.f32 0.0, %v1448_v41  ;;  %v1468_v37 = vsel %vm1467_vm10, %v1466_v29, %v1450_v3  ;;  %v1469_v19 = vrot.slane %v1454_v32, 6  ;;  %v1717_v5 = vrot.slane %v1715_v23, 3 }
 0x160   : > { %v1457_v1 = vsub.f32 0.0, %v1449_v18  ;;  %v1476_v17 = vsel %vm1467_vm10, %v1475_v25, %v1451_v43  ;;  %v1477_v20 = vrot.slane %v1455_v12, 6 }
 0x161   : > { %v1471_v26 = vsel %vm1470_vm11, %v1469_v19, %v1468_v37  ;;  %v1472_v34 = vrot.slane %v1456_v36, 5 }
 0x162   : > { %v1478_v24 = vsel %vm1470_vm11, %v1477_v20, %v1476_v17  ;;  %v1479_v13 = vrot.slane %v1457_v1, 5 }
 0x163   : > { %v1474_v11 = vsel %vm1473_vm12, %v1472_v34, %v1471_v26 }
 0x164   : > { %v1480_v33 = vsel %vm1473_vm12, %v1479_v13, %v1478_v24  ;;  %v1484_v30 = vsel %vm1483_vm13, %v1474_v11, 0.0 }
 0x165   : > { %v1485_v31 = vrot.slane %v1484_v30, 4  ;;  %v1491_v56 = vsel %vm1483_vm13, %v1480_v33, 0.0 }
 0x166   : > { %v1492_v51 = vrot.slane %v1491_v56, 4 }
 0x167   : > { %v1486_v7 = vadd.f32 %v1485_v31, %v1484_v30 }
 0x168   : > { %v1493_v0 = vadd.f32 %v1492_v51, %v1491_v56 }
 0x169   : > { %v1487_v8 = vrot.slane %v1486_v7, 2 }
 0x16a   : > { %v1494_v42 = vrot.slane %v1493_v0, 2 }
 0x16b   : > { %v1488_v38 = vadd.f32 %v1487_v8, %v1486_v7 }
 0x16c   : > { %v1495_v50 = vadd.f32 %v1494_v42, %v1493_v0 }
 0x16d   : > { %v1489_v54 = vrot.slane %v1488_v38, 1 }
 0x16e   : > { %v1496_v52 = vrot.slane %v1495_v50, 1 }
 0x16f   : > { %v1490_v47 = vadd.f32 %v1489_v54, %v1488_v38 }
 0x170   : > { %v1497_v61 = vadd.f32 %v1496_v52, %v1495_v50 }
 0x171   : > { %v1500_v63 = vrot.slane %v1490_v47, 3 }
 0x172   : > { %v1501_v2 = vrot.slane %v1497_v61, 3 }
 0x173   : > { %v1504_v59 = vsel %vm3034_vm3, %v1500_v63, 0.0  ;;  %vm1720_vm3 = vcmp.eq.s32.totalorder %v3504_v39, 2 }
 0x174   : > { %v1505_v22 = vsel %vm3049_vm4, %v1501_v2, 0.0  ;;  %v1507_v4 = vsel %vm3502_vm14, %v1504_v59, 0.0  ;;  %vm1723_vm4 = vcmp.eq.s32.totalorder %v3504_v39, 3 }
 0x175   : > { %v1508_v28 = vsel %vm3503_vm15, %v1505_v22, 0.0 }
 0x176   : > { %v1509_v40 = vadd.f32 %v1508_v28, %v1507_v4 }
 0x178   : > { %1510 = vadd.xlane.f32.xlu0 %v1509_v40 }
 0x179   : > { %v1704_v9 = vpop.xlane.xlu1 %1703 }
 0x17a   : > { %v1721_v44 = vsel %vm1720_vm3, %v1704_v9, 0.0 }
 0x1d2   : > { %v1711_v10 = vpop.xlane.xlu1 %1710 }
 0x1d3   : > { %v1724_v45 = vsel %vm1723_vm4, %v1711_v10, 0.0 }
 0x201   : > { %v1511_v14 = vpop.xlane.xlu0 %1510 }
 0x202   : > { %v1713_v35 = vsel %vm1712_vm1, %v1511_v14, 0.0 }
 0x203   : > { %v1719_v15 = vadd.f32 %v1717_v5, %v1713_v35 }
 0x205   : > { %v1722_v49 = vadd.f32 %v1721_v44, %v1719_v15 }
 0x207   : > { %v1725_v46 = vadd.f32 %v1724_v45, %v1722_v49 }
 0x209   : > { %1726 = vst [vmem:[%s773_s30 - $0x5] sm:$0x20] %v1725_v46 }
 0x20a PF: > { %p9_p0 = scmp.ge.s32.totalorder %s2380_s13, 4   ;;  %s3505_s9 = smov %s2272_s10 }
 0x20b   : > { %s3506_s10 = smov %s2389_s16  ;;  %s3507_s11 = smov %s2380_s13 }
 0x20c   :  { %11 = sbr.rel (!%p9_p0) target bundleno = 2 (0x2), region = 194 }

</bundles_post_ra>
